<compile_context>
chip_gen: v5e
topology: v5e:2x2
jax: 0.10.0
libtpu: 0.0.40
codegen_flags: <defaults>
</compile_context>

<pallas_src>
import functools
import math

import jax
import jax.numpy as jnp
from jax import lax
from jax.experimental import pallas as pl
from jax.experimental.pallas import tpu as pltpu


# ---------------- in-kernel math helpers (f32) ----------------

def _layernorm(h, w, b, eps=1e-5):
    mu = jnp.mean(h, axis=-1, keepdims=True)
    var = jnp.mean((h - mu) ** 2, axis=-1, keepdims=True)
    return (h - mu) * lax.rsqrt(var + eps) * w + b


def _gelu_tanh(x):
    # matches torch.nn.GELU(approximate='tanh')
    c = math.sqrt(2.0 / math.pi)
    return 0.5 * x * (1.0 + jnp.tanh(c * (x + 0.044715 * x * x * x)))


# ---------------- kernel 1: ln_1 + Q/K/V projections (row tile) ----------------
# Emits Q, K, V as three channel-major (B, T, C) bf16 arrays so the flash kernel
# can read 128-lane head-group slabs directly (no XLA head split / transpose).

def _ln_qkv_kernel(x_ref, ln1w_ref, ln1b_ref, wq_ref, wk_ref, wv_ref,
                   bq_ref, bk_ref, bv_ref, q_ref, k_ref, v_ref):
    x = x_ref[0]                                            # (tr, C) f32
    h = _layernorm(x, ln1w_ref[0], ln1b_ref[0]).astype(jnp.bfloat16)
    q_ref[0] = (jnp.dot(h, wq_ref[...], preferred_element_type=jnp.float32)
                + bq_ref[0]).astype(q_ref.dtype)
    k_ref[0] = (jnp.dot(h, wk_ref[...], preferred_element_type=jnp.float32)
                + bk_ref[0]).astype(k_ref.dtype)
    v_ref[0] = (jnp.dot(h, wv_ref[...], preferred_element_type=jnp.float32)
                + bv_ref[0]).astype(v_ref.dtype)


# ---------------- kernel 2: causal flash attention (online softmax) ----------------
# Grid = (batch, head-group, lower-triangular (q-tile, kv-tile) pairs).
# Each block is a hpb-head / (hpb*hd)-lane column slab of the (B, T, C) arrays,
# so the output store is lane-dense and goes straight into a (B, T, C) buffer.

def _make_flash_kernel(tq, hd, hpb):
    def kernel(qi_tab, ki_tab, q_ref, k_ref, v_ref, o_ref, m_sc, l_sc, acc_sc):
        p = pl.program_id(2)
        qi = qi_tab[p]                       # q-tile index of this step (SMEM)
        ki = ki_tab[p]                       # kv-tile index of this step (SMEM)

        @pl.when(ki == 0)
        def _init():
            m_sc[...] = jnp.full(m_sc.shape, -jnp.inf, jnp.float32)
            l_sc[...] = jnp.zeros(l_sc.shape, jnp.float32)
            acc_sc[...] = jnp.zeros(acc_sc.shape, jnp.float32)

        q = q_ref[0]                         # (tq, hpb*hd) bf16, Q pre-scaled by 1/sqrt(hd)
        k = k_ref[0]                         # (tq, hpb*hd) bf16
        v = v_ref[0]                         # (tq, hpb*hd) bf16

        def scores(h):
            sl = slice(h * hd, (h + 1) * hd)
            # q_h @ k_h^T without an explicit transpose (contract last dims).
            return lax.dot_general(q[:, sl], k[:, sl], (((1,), (1,)), ((), ())),
                                   preferred_element_type=jnp.float32)

        def update(h, s):                    # online-softmax update for head h
            m_prev = m_sc[h]                                        # (tq, 1)
            m_new = jnp.maximum(m_prev, jnp.max(s, axis=-1, keepdims=True))
            alpha = jnp.exp(m_prev - m_new)
            pm = jnp.exp(s - m_new)                                  # f32 probs
            l_sc[h] = alpha * l_sc[h] + jnp.sum(pm, axis=-1, keepdims=True)
            acc_sc[h] = alpha * acc_sc[h] + jnp.dot(
                pm.astype(jnp.bfloat16), v[:, h * hd:(h + 1) * hd],
                preferred_element_type=jnp.float32)
            m_sc[h] = m_new

        # Interior kv tiles (strictly below the diagonal): fully visible, no mask.
        @pl.when(ki < qi)
        def _interior():
            for h in range(hpb):
                update(h, scores(h))

        # Diagonal tile: apply causal mask, update, and emit the finished q-tile
        # with a single lane-dense store (this is the last kv step for this q-tile).
        @pl.when(ki == qi)
        def _diag_finalize():
            row = lax.broadcasted_iota(jnp.int32, (tq, tq), 0)
            col = lax.broadcasted_iota(jnp.int32, (tq, tq), 1)
            mask = row >= col                # tq == tkv -> local compare suffices
            outs = []
            for h in range(hpb):
                update(h, jnp.where(mask, scores(h), -1e30))
                inv_l = pl.reciprocal(l_sc[h], approx=True)          # EUP reciprocal
                outs.append(acc_sc[h] * inv_l)
            o_ref[0] = jnp.concatenate(outs, axis=-1).astype(o_ref.dtype)

    return kernel


# ---------------- kernel 3: attn c_proj + residual + ln_2 + MLP + residual ----------------

def _proj_mlp_kernel(x_ref, y_ref, wpr_ref, bpr_ref, ln2w_ref, ln2b_ref,
                     wfc_ref, bfc_ref, wpj_ref, bpj_ref, o_ref):
    x = x_ref[0]                                            # (tr, C) f32 residual stream
    y = y_ref[0]                                            # (tr, C) bf16 attention output
    attn = jnp.dot(y, wpr_ref[...], preferred_element_type=jnp.float32) + bpr_ref[0]
    x1 = x + attn                                           # x + attn(ln_1(x))
    h = _layernorm(x1, ln2w_ref[0], ln2b_ref[0])            # f32
    u = jnp.dot(h.astype(jnp.bfloat16), wfc_ref[...],
                preferred_element_type=jnp.float32) + bfc_ref[0]
    g = _gelu_tanh(u)                                       # f32
    m = jnp.dot(g.astype(jnp.bfloat16), wpj_ref[...],
                preferred_element_type=jnp.float32) + bpj_ref[0]
    o_ref[0] = (x1 + m).astype(o_ref.dtype)


# ---------------- wrapper ----------------

def gpt2_block(x, params, n_head, *, row_tile=None, seq_tile=None):
    """x: (B, T, C) float32. params: (ln1w, ln1b, wqkv, bqkv, wpr, bpr, ln2w, ln2b, wfc, bfc, wpj, bpj)."""
    (ln1w, ln1b, wqkv, bqkv, wpr, bpr, ln2w, ln2b, wfc, bfc, wpj, bpj) = params
    B, T, C = x.shape
    assert C % n_head == 0
    hd = C // n_head
    bf16 = jnp.bfloat16

    # Heads per flash block: keep flash in/out blocks at >=128 lanes when possible
    # (lane-dense stores, bigger DMAs, fewer grid steps).  GPT-2: hd=64 -> 2 heads.
    if C % 128 == 0 and 128 % hd == 0:
        hpb = 128 // hd
    elif hd % 128 == 0:
        hpb = 1
    else:
        hpb = n_head                         # tiny shapes: one slab = all heads (== C lanes)
    gw = hpb * hd                            # lane width of each flash block
    n_hg = n_head // hpb                     # head groups
    assert n_head % hpb == 0 and C % gw == 0

    def pick_tile(t, cap=256):
        for c in (cap, 256, 128, 64, 32, 16, 8):
            if c <= cap and t % c == 0:
                return c
        return t

    tr = row_tile if row_tile is not None else pick_tile(T)   # row tile (kernels 1 & 3)
    tq = seq_tile if seq_tile is not None else pick_tile(T)   # q/kv tile (flash kernel)
    assert T % tr == 0 and T % tq == 0
    nr, nq = T // tr, T // tq

    # ---- host-side weight prep: split QKV, fold softmax scale into Q, cast to bf16 ----
    scale = 1.0 / math.sqrt(hd)
    wq = (wqkv[:, :C] * scale).astype(bf16)
    wk = wqkv[:, C:2 * C].astype(bf16)
    wv = wqkv[:, 2 * C:].astype(bf16)
    bq = bqkv[:, :C] * scale
    bk = bqkv[:, C:2 * C]
    bv = bqkv[:, 2 * C:]
    wpr_h, wfc_h, wpj_h = (w.astype(bf16) for w in (wpr, wfc, wpj))

    def rep(shape):  # grid-invariant weight/bias block, replicated across the (b, r) grid
        nd = len(shape)
        return pl.BlockSpec(shape, lambda b, r, nd=nd: (0,) * nd)
    # TODO(synk): mark rep() specs pipeline_mode=pl.Buffered(1) (single-buffered) once
    # verified on-device; halves resident weight VMEM, which matters on v7x (64 MiB).

    def vmem_limit(work_bytes):
        # Per-kernel scoped-VMEM budget: working set + headroom, capped below
        # v7x's 64 MiB physical VMEM (v5e/v6e have 128 MiB and are never tight).
        return int(min(max(work_bytes + (12 << 20), 32 << 20), 52 << 20))

    # ---- 1) ln_1 + Q/K/V projections, tiled over (batch, sequence rows) ----
    k1_work = (2 * tr * C * 4                         # x tiles (double-buffered)
               + 2 * (3 * C * C * 2 + 6 * C * 4)      # weights + biases
               + 2 * 3 * tr * C * 2)                  # q/k/v output tiles
    q, k, v = pl.pallas_call(
        _ln_qkv_kernel,
        out_shape=tuple(jax.ShapeDtypeStruct((B, T, C), bf16) for _ in range(3)),
        grid_spec=pltpu.PrefetchScalarGridSpec(
            num_scalar_prefetch=0,
            grid=(B, nr),
            in_specs=[
                pl.BlockSpec((1, tr, C), lambda b, r: (b, r, 0)),   # x
                rep((1, C)), rep((1, C)),                           # ln_1 weight, bias
                rep((C, C)), rep((C, C)), rep((C, C)),              # Wq (pre-scaled), Wk, Wv
                rep((1, C)), rep((1, C)), rep((1, C)),              # bq (pre-scaled), bk, bv
            ],
            out_specs=tuple(pl.BlockSpec((1, tr, C), lambda b, r: (b, r, 0))
                            for _ in range(3)),
        ),
        compiler_params=pltpu.CompilerParams(
            dimension_semantics=("parallel", "parallel"),
            vmem_limit_bytes=vmem_limit(k1_work)),
        cost_estimate=pl.CostEstimate(
            flops=2 * B * T * C * 3 * C,
            transcendentals=B * T,
            bytes_accessed=4 * B * T * C + 3 * 2 * B * T * C + 2 * 3 * C * C),
    )(x, ln1w, ln1b, wq, wk, wv, bq, bk, bv)

    # ---- 2) causal flash attention over the lower-triangular (q, kv) tile schedule ----
    pairs = [(i, j) for i in range(nq) for j in range(i + 1)]
    qi_tab = jnp.asarray([i for i, _ in pairs], dtype=jnp.int32)
    ki_tab = jnp.asarray([j for _, j in pairs], dtype=jnp.int32)
    n_pairs = len(pairs)

    fl_work = (2 * 4 * tq * gw * 2                    # q/k/v/out tiles (double-buffered)
               + hpb * tq * (hd + 2) * 4)             # m/l/acc scratch
    y = pl.pallas_call(
        _make_flash_kernel(tq, hd, hpb),
        out_shape=jax.ShapeDtypeStruct((B, T, C), bf16),
        grid_spec=pltpu.PrefetchScalarGridSpec(
            num_scalar_prefetch=2,                    # (qi_tab, ki_tab) in SMEM
            grid=(B, n_hg, n_pairs),
            in_specs=[
                pl.BlockSpec((1, tq, gw), lambda b, g, p, qt, kt: (b, qt[p], g)),  # q slab
                pl.BlockSpec((1, tq, gw), lambda b, g, p, qt, kt: (b, kt[p], g)),  # k slab
                pl.BlockSpec((1, tq, gw), lambda b, g, p, qt, kt: (b, kt[p], g)),  # v slab
            ],
            out_specs=pl.BlockSpec((1, tq, gw), lambda b, g, p, qt, kt: (b, qt[p], g)),
            scratch_shapes=[
                pltpu.VMEM((hpb, tq, 1), jnp.float32),    # running max  m (per head)
                pltpu.VMEM((hpb, tq, 1), jnp.float32),    # running sum  l (per head)
                pltpu.VMEM((hpb, tq, hd), jnp.float32),   # output accumulator
            ],
        ),
        compiler_params=pltpu.CompilerParams(
            dimension_semantics=("parallel", "parallel", "arbitrary"),
            vmem_limit_bytes=vmem_limit(fl_work)),
        cost_estimate=pl.CostEstimate(
            flops=2 * B * n_head * T * T * hd,            # causal: ~half of dense
            transcendentals=B * n_head * T * T // 2,
            bytes_accessed=4 * 2 * B * T * C),
    )(qi_tab, ki_tab, q, k, v)

    # ---- 3) attn c_proj + residual + ln_2 + MLP(GELU tanh) + residual, row-tiled ----
    k3_work = (2 * tr * C * 4 + 2 * tr * C * 2 + 2 * tr * C * 4   # x, y, out tiles
               + 2 * 9 * C * C * 2                                # c_proj + MLP weights
               + 2 * tr * 4 * C * 4)                              # (tr, 4C) intermediates
    out = pl.pallas_call(
        _proj_mlp_kernel,
        out_shape=jax.ShapeDtypeStruct((B, T, C), x.dtype),
        grid_spec=pltpu.PrefetchScalarGridSpec(
            num_scalar_prefetch=0,
            grid=(B, nr),
            in_specs=[
                pl.BlockSpec((1, tr, C), lambda b, r: (b, r, 0)),   # residual x
                pl.BlockSpec((1, tr, C), lambda b, r: (b, r, 0)),   # attention output (channel-major)
                rep((C, C)), rep((1, C)),                           # attn c_proj weight (bf16), bias
                rep((1, C)), rep((1, C)),                           # ln_2 weight, bias
                rep((C, 4 * C)), rep((1, 4 * C)),                   # mlp c_fc weight (bf16), bias
                rep((4 * C, C)), rep((1, C)),                       # mlp c_proj weight (bf16), bias
            ],
            out_specs=pl.BlockSpec((1, tr, C), lambda b, r: (b, r, 0)),
        ),
        compiler_params=pltpu.CompilerParams(
            dimension_semantics=("parallel", "parallel"),
            vmem_limit_bytes=vmem_limit(k3_work)),
        cost_estimate=pl.CostEstimate(
            flops=2 * B * T * (C * C + 8 * C * C),
            transcendentals=B * T * 4 * C,
            bytes_accessed=10 * B * T * C + 2 * 9 * C * C),
    )(x, y, wpr_h, bpr, ln2w, ln2b, wfc_h, bfc, wpj_h, bpj)

    return out


# ---------------- pure-JAX f32 reference (for the sanity check) ----------------

def gpt2_block_ref(x, params, n_head):
    (ln1w, ln1b, wqkv, bqkv, wpr, bpr, ln2w, ln2b, wfc, bfc, wpj, bpj) = params
    B, T, C = x.shape
    hd = C // n_head
    scale = 1.0 / math.sqrt(hd)

    h = _layernorm(x, ln1w[0], ln1b[0])
    qkv = h @ wqkv + bqkv[0]
    q, k, v = jnp.split(qkv, 3, axis=-1)
    q = q.reshape(B, T, n_head, hd).transpose(0, 2, 1, 3)
    k = k.reshape(B, T, n_head, hd).transpose(0, 2, 1, 3)
    v = v.reshape(B, T, n_head, hd).transpose(0, 2, 1, 3)
    s = jnp.einsum("bhtd,bhsd->bhts", q, k) * scale
    mask = jnp.tril(jnp.ones((T, T), bool))
    s = jnp.where(mask, s, -1e30)
    p = jax.nn.softmax(s, axis=-1)
    y = jnp.einsum("bhts,bhsd->bhtd", p, v)
    y = y.transpose(0, 2, 1, 3).reshape(B, T, C)
    x = x + (y @ wpr + bpr[0])

    h2 = _layernorm(x, ln2w[0], ln2b[0])
    u = h2 @ wfc + bfc[0]
    g = _gelu_tanh(u)
    return x + (g @ wpj + bpj[0])


# ---------------- main ----------------

if __name__ == "__main__":
    # small shapes consistent with the module: B=2, T=16, n_embd=32, n_head=4
    # (tiles of 8 so the row grid, the lower-triangular flash schedule, and the
    #  interior/diagonal kv paths all take >1 step)
    B, T, C, H = 2, 16, 32, 4

    key = jax.random.PRNGKey(0)
    ks = jax.random.split(key, 6)
    x = jax.random.normal(ks[0], (B, T, C), jnp.float32)

    std = 0.02  # GPT-2 style init, deterministic
    params = (
        jnp.ones((1, C), jnp.float32),                                   # ln_1.weight
        jnp.zeros((1, C), jnp.float32),                                  # ln_1.bias
        std * jax.random.normal(ks[1], (C, 3 * C), jnp.float32),         # c_attn.weight (in,out)
        jnp.zeros((1, 3 * C), jnp.float32),                              # c_attn.bias
        std * jax.random.normal(ks[2], (C, C), jnp.float32),             # attn c_proj.weight
        jnp.zeros((1, C), jnp.float32),                                  # attn c_proj.bias
        jnp.ones((1, C), jnp.float32),                                   # ln_2.weight
        jnp.zeros((1, C), jnp.float32),                                  # ln_2.bias
        std * jax.random.normal(ks[3], (C, 4 * C), jnp.float32),         # mlp c_fc.weight
        jnp.zeros((1, 4 * C), jnp.float32),                              # mlp c_fc.bias
        std * jax.random.normal(ks[4], (4 * C, C), jnp.float32),         # mlp c_proj.weight
        jnp.zeros((1, C), jnp.float32),                                  # mlp c_proj.bias
    )

    fwd = jax.jit(functools.partial(gpt2_block, n_head=H, row_tile=8, seq_tile=8))
    out = jax.block_until_ready(fwd(x, params))

    ref = gpt2_block_ref(x, params, H)
    assert out.shape == (B, T, C)
    max_err = float(jnp.max(jnp.abs(out - ref)))
    # bf16 matmul operands with f32 accumulation vs. a pure-f32 reference
    assert jnp.allclose(out, ref, atol=1e-2, rtol=1e-2), f"mismatch vs reference (max abs err {max_err})"

    print("KERNEL_OK")
</pallas_src>

<mosaic_0001>
module attributes {stable_mosaic.version = 11 : i64} {
  func.func @_ln_qkv_kernel(%arg0: i32, %arg1: i32, %arg2: memref<1x8x32xf32, #tpu.memory_space<vmem>>, %arg3: memref<1x32xf32, #tpu.memory_space<vmem>>, %arg4: memref<1x32xf32, #tpu.memory_space<vmem>>, %arg5: memref<32x32xbf16, #tpu.memory_space<vmem>>, %arg6: memref<32x32xbf16, #tpu.memory_space<vmem>>, %arg7: memref<32x32xbf16, #tpu.memory_space<vmem>>, %arg8: memref<1x32xf32, #tpu.memory_space<vmem>>, %arg9: memref<1x32xf32, #tpu.memory_space<vmem>>, %arg10: memref<1x32xf32, #tpu.memory_space<vmem>>, %arg11: memref<1x8x32xbf16, #tpu.memory_space<vmem>>, %arg12: memref<1x8x32xbf16, #tpu.memory_space<vmem>>, %arg13: memref<1x8x32xbf16, #tpu.memory_space<vmem>>) attributes {dimension_semantics = [#tpu.dimension_semantics<parallel>, #tpu.dimension_semantics<parallel>], iteration_bounds = array<i64: 2, 2>, scalar_prefetch = 0 : i64, scratch_operands = 0 : i64, tpu.core_type = #tpu.core_type<tc>, window_params = [{transform_indices = @transform_0, window_bounds = array<i64: 1, 8, 32>}, {pipeline_mode = #tpu.pipeline_mode<synchronous>, transform_indices = @transform_1, window_bounds = array<i64: 1, 32>}, {pipeline_mode = #tpu.pipeline_mode<synchronous>, transform_indices = @transform_2, window_bounds = array<i64: 1, 32>}, {pipeline_mode = #tpu.pipeline_mode<synchronous>, transform_indices = @transform_3, window_bounds = array<i64: 32, 32>}, {pipeline_mode = #tpu.pipeline_mode<synchronous>, transform_indices = @transform_4, window_bounds = array<i64: 32, 32>}, {pipeline_mode = #tpu.pipeline_mode<synchronous>, transform_indices = @transform_5, window_bounds = array<i64: 32, 32>}, {pipeline_mode = #tpu.pipeline_mode<synchronous>, transform_indices = @transform_6, window_bounds = array<i64: 1, 32>}, {pipeline_mode = #tpu.pipeline_mode<synchronous>, transform_indices = @transform_7, window_bounds = array<i64: 1, 32>}, {pipeline_mode = #tpu.pipeline_mode<synchronous>, transform_indices = @transform_8, window_bounds = array<i64: 1, 32>}, {transform_indices = @transform_9, window_bounds = array<i64: 1, 8, 32>}, {transform_indices = @transform_10, window_bounds = array<i64: 1, 8, 32>}, {transform_indices = @transform_11, window_bounds = array<i64: 1, 8, 32>}]} {
    %c0 = arith.constant 0 : index
    %c0_0 = arith.constant 0 : index
    %c0_1 = arith.constant 0 : index
    %0 = vector.load %arg2[%c0, %c0_0, %c0_1] : memref<1x8x32xf32, #tpu.memory_space<vmem>>, vector<1x8x32xf32>
    %1 = vector.shape_cast %0 : vector<1x8x32xf32> to vector<8x32xf32>
    %c0_2 = arith.constant 0 : index
    %c0_3 = arith.constant 0 : index
    %2 = vector.load %arg3[%c0_2, %c0_3] : memref<1x32xf32, #tpu.memory_space<vmem>>, vector<1x32xf32>
    %3 = vector.shape_cast %2 : vector<1x32xf32> to vector<32xf32>
    %c0_4 = arith.constant 0 : index
    %c0_5 = arith.constant 0 : index
    %4 = vector.load %arg4[%c0_4, %c0_5] : memref<1x32xf32, #tpu.memory_space<vmem>>, vector<1x32xf32>
    %5 = vector.shape_cast %4 : vector<1x32xf32> to vector<32xf32>
    %cst = arith.constant dense<0.000000e+00> : vector<8xf32>
    %6 = vector.multi_reduction <add>, %1, %cst [1] : vector<8x32xf32> to vector<8xf32>
    %7 = vector.shape_cast %6 : vector<8xf32> to vector<8x1xf32>
    %cst_6 = arith.constant 3.200000e+01 : f32
    %8 = vector.broadcast %cst_6 : f32 to vector<8x1xf32>
    %9 = arith.divf %7, %8 : vector<8x1xf32>
    %10 = vector.broadcast %9 : vector<8x1xf32> to vector<8x32xf32>
    %11 = arith.subf %1, %10 : vector<8x32xf32>
    %12 = arith.mulf %11, %11 : vector<8x32xf32>
    %cst_7 = arith.constant dense<0.000000e+00> : vector<8xf32>
    %13 = vector.multi_reduction <add>, %12, %cst_7 [1] : vector<8x32xf32> to vector<8xf32>
    %14 = vector.shape_cast %13 : vector<8xf32> to vector<8x1xf32>
    %cst_8 = arith.constant 3.200000e+01 : f32
    %15 = vector.broadcast %cst_8 : f32 to vector<8x1xf32>
    %16 = arith.divf %14, %15 : vector<8x1xf32>
    %17 = vector.broadcast %9 : vector<8x1xf32> to vector<8x32xf32>
    %18 = arith.subf %1, %17 : vector<8x32xf32>
    %cst_9 = arith.constant 9.99999974E-6 : f32
    %19 = vector.broadcast %cst_9 : f32 to vector<8x1xf32>
    %20 = arith.addf %16, %19 : vector<8x1xf32>
    %21 = math.rsqrt %20 : vector<8x1xf32>
    %22 = vector.broadcast %21 : vector<8x1xf32> to vector<8x32xf32>
    %23 = arith.mulf %18, %22 : vector<8x32xf32>
    %24 = vector.shape_cast %3 : vector<32xf32> to vector<1x32xf32>
    %25 = vector.broadcast %24 : vector<1x32xf32> to vector<8x32xf32>
    %26 = arith.mulf %23, %25 : vector<8x32xf32>
    %27 = vector.shape_cast %5 : vector<32xf32> to vector<1x32xf32>
    %28 = vector.broadcast %27 : vector<1x32xf32> to vector<8x32xf32>
    %29 = arith.addf %26, %28 : vector<8x32xf32>
    %30 = arith.truncf %29 : vector<8x32xf32> to vector<8x32xbf16>
    %c0_10 = arith.constant 0 : index
    %c0_11 = arith.constant 0 : index
    %31 = vector.load %arg5[%c0_10, %c0_11] : memref<32x32xbf16, #tpu.memory_space<vmem>>, vector<32x32xbf16>
    %cst_12 = arith.constant dense<0.000000e+00> : vector<8x32xf32>
    %32 = tpu.matmul %30, %31, %cst_12 {dimension_numbers = #tpu.dot_dimension_numbers<[1], [0], [0], [1], [0, 0, 1, 1], [], []>} : vector<8x32xbf16>, vector<32x32xbf16>, vector<8x32xf32> -> vector<8x32xf32>
    %c0_13 = arith.constant 0 : index
    %c0_14 = arith.constant 0 : index
    %33 = vector.load %arg8[%c0_13, %c0_14] : memref<1x32xf32, #tpu.memory_space<vmem>>, vector<1x32xf32>
    %34 = vector.shape_cast %33 : vector<1x32xf32> to vector<32xf32>
    %35 = vector.shape_cast %34 : vector<32xf32> to vector<1x32xf32>
    %36 = vector.broadcast %35 : vector<1x32xf32> to vector<8x32xf32>
    %37 = arith.addf %32, %36 : vector<8x32xf32>
    %38 = arith.truncf %37 : vector<8x32xf32> to vector<8x32xbf16>
    %c0_15 = arith.constant 0 : index
    %c0_16 = arith.constant 0 : index
    %c0_17 = arith.constant 0 : index
    %39 = vector.load %arg11[%c0_15, %c0_16, %c0_17] : memref<1x8x32xbf16, #tpu.memory_space<vmem>>, vector<1x8x32xbf16>
    %40 = vector.shape_cast %39 : vector<1x8x32xbf16> to vector<8x32xbf16>
    %41 = vector.shape_cast %38 : vector<8x32xbf16> to vector<1x8x32xbf16>
    tpu.vector_store %arg11[%c0_15, %c0_16, %c0_17], %41 {strides = array<i32>} : memref<1x8x32xbf16, #tpu.memory_space<vmem>>, vector<1x8x32xbf16>,
    %c0_18 = arith.constant 0 : index
    %c0_19 = arith.constant 0 : index
    %42 = vector.load %arg6[%c0_18, %c0_19] : memref<32x32xbf16, #tpu.memory_space<vmem>>, vector<32x32xbf16>
    %cst_20 = arith.constant dense<0.000000e+00> : vector<8x32xf32>
    %43 = tpu.matmul %30, %42, %cst_20 {dimension_numbers = #tpu.dot_dimension_numbers<[1], [0], [0], [1], [0, 0, 1, 1], [], []>} : vector<8x32xbf16>, vector<32x32xbf16>, vector<8x32xf32> -> vector<8x32xf32>
    %c0_21 = arith.constant 0 : index
    %c0_22 = arith.constant 0 : index
    %44 = vector.load %arg9[%c0_21, %c0_22] : memref<1x32xf32, #tpu.memory_space<vmem>>, vector<1x32xf32>
    %45 = vector.shape_cast %44 : vector<1x32xf32> to vector<32xf32>
    %46 = vector.shape_cast %45 : vector<32xf32> to vector<1x32xf32>
    %47 = vector.broadcast %46 : vector<1x32xf32> to vector<8x32xf32>
    %48 = arith.addf %43, %47 : vector<8x32xf32>
    %49 = arith.truncf %48 : vector<8x32xf32> to vector<8x32xbf16>
    %c0_23 = arith.constant 0 : index
    %c0_24 = arith.constant 0 : index
    %c0_25 = arith.constant 0 : index
    %50 = vector.load %arg12[%c0_23, %c0_24, %c0_25] : memref<1x8x32xbf16, #tpu.memory_space<vmem>>, vector<1x8x32xbf16>
    %51 = vector.shape_cast %50 : vector<1x8x32xbf16> to vector<8x32xbf16>
    %52 = vector.shape_cast %49 : vector<8x32xbf16> to vector<1x8x32xbf16>
    tpu.vector_store %arg12[%c0_23, %c0_24, %c0_25], %52 {strides = array<i32>} : memref<1x8x32xbf16, #tpu.memory_space<vmem>>, vector<1x8x32xbf16>,
    %c0_26 = arith.constant 0 : index
    %c0_27 = arith.constant 0 : index
    %53 = vector.load %arg7[%c0_26, %c0_27] : memref<32x32xbf16, #tpu.memory_space<vmem>>, vector<32x32xbf16>
    %cst_28 = arith.constant dense<0.000000e+00> : vector<8x32xf32>
    %54 = tpu.matmul %30, %53, %cst_28 {dimension_numbers = #tpu.dot_dimension_numbers<[1], [0], [0], [1], [0, 0, 1, 1], [], []>} : vector<8x32xbf16>, vector<32x32xbf16>, vector<8x32xf32> -> vector<8x32xf32>
    %c0_29 = arith.constant 0 : index
    %c0_30 = arith.constant 0 : index
    %55 = vector.load %arg10[%c0_29, %c0_30] : memref<1x32xf32, #tpu.memory_space<vmem>>, vector<1x32xf32>
    %56 = vector.shape_cast %55 : vector<1x32xf32> to vector<32xf32>
    %57 = vector.shape_cast %56 : vector<32xf32> to vector<1x32xf32>
    %58 = vector.broadcast %57 : vector<1x32xf32> to vector<8x32xf32>
    %59 = arith.addf %54, %58 : vector<8x32xf32>
    %60 = arith.truncf %59 : vector<8x32xf32> to vector<8x32xbf16>
    %c0_31 = arith.constant 0 : index
    %c0_32 = arith.constant 0 : index
    %c0_33 = arith.constant 0 : index
    %61 = vector.load %arg13[%c0_31, %c0_32, %c0_33] : memref<1x8x32xbf16, #tpu.memory_space<vmem>>, vector<1x8x32xbf16>
    %62 = vector.shape_cast %61 : vector<1x8x32xbf16> to vector<8x32xbf16>
    %63 = vector.shape_cast %60 : vector<8x32xbf16> to vector<1x8x32xbf16>
    tpu.vector_store %arg13[%c0_31, %c0_32, %c0_33], %63 {strides = array<i32>} : memref<1x8x32xbf16, #tpu.memory_space<vmem>>, vector<1x8x32xbf16>,
    return
  }
  func.func @transform_0(%arg0: i32, %arg1: i32) -> (i32, i32, i32) {
    %c0_i32 = arith.constant 0 : i32
    %c0_i32_0 = arith.constant 0 : i32
    return %arg0, %arg1, %c0_i32 : i32, i32, i32
  }
  func.func @transform_1(%arg0: i32, %arg1: i32) -> (i32, i32) {
    %c0_i32 = arith.constant 0 : i32
    %c0_i32_0 = arith.constant 0 : i32
    %c0_i32_1 = arith.constant 0 : i32
    return %c0_i32, %c0_i32_0 : i32, i32
  }
  func.func @transform_2(%arg0: i32, %arg1: i32) -> (i32, i32) {
    %c0_i32 = arith.constant 0 : i32
    %c0_i32_0 = arith.constant 0 : i32
    %c0_i32_1 = arith.constant 0 : i32
    return %c0_i32, %c0_i32_0 : i32, i32
  }
  func.func @transform_3(%arg0: i32, %arg1: i32) -> (i32, i32) {
    %c0_i32 = arith.constant 0 : i32
    %c0_i32_0 = arith.constant 0 : i32
    %c0_i32_1 = arith.constant 0 : i32
    return %c0_i32, %c0_i32_0 : i32, i32
  }
  func.func @transform_4(%arg0: i32, %arg1: i32) -> (i32, i32) {
    %c0_i32 = arith.constant 0 : i32
    %c0_i32_0 = arith.constant 0 : i32
    %c0_i32_1 = arith.constant 0 : i32
    return %c0_i32, %c0_i32_0 : i32, i32
  }
  func.func @transform_5(%arg0: i32, %arg1: i32) -> (i32, i32) {
    %c0_i32 = arith.constant 0 : i32
    %c0_i32_0 = arith.constant 0 : i32
    %c0_i32_1 = arith.constant 0 : i32
    return %c0_i32, %c0_i32_0 : i32, i32
  }
  func.func @transform_6(%arg0: i32, %arg1: i32) -> (i32, i32) {
    %c0_i32 = arith.constant 0 : i32
    %c0_i32_0 = arith.constant 0 : i32
    %c0_i32_1 = arith.constant 0 : i32
    return %c0_i32, %c0_i32_0 : i32, i32
  }
  func.func @transform_7(%arg0: i32, %arg1: i32) -> (i32, i32) {
    %c0_i32 = arith.constant 0 : i32
    %c0_i32_0 = arith.constant 0 : i32
    %c0_i32_1 = arith.constant 0 : i32
    return %c0_i32, %c0_i32_0 : i32, i32
  }
  func.func @transform_8(%arg0: i32, %arg1: i32) -> (i32, i32) {
    %c0_i32 = arith.constant 0 : i32
    %c0_i32_0 = arith.constant 0 : i32
    %c0_i32_1 = arith.constant 0 : i32
    return %c0_i32, %c0_i32_0 : i32, i32
  }
  func.func @transform_9(%arg0: i32, %arg1: i32) -> (i32, i32, i32) {
    %c0_i32 = arith.constant 0 : i32
    %c0_i32_0 = arith.constant 0 : i32
    return %arg0, %arg1, %c0_i32 : i32, i32, i32
  }
  func.func @transform_10(%arg0: i32, %arg1: i32) -> (i32, i32, i32) {
    %c0_i32 = arith.constant 0 : i32
    %c0_i32_0 = arith.constant 0 : i32
    return %arg0, %arg1, %c0_i32 : i32, i32, i32
  }
  func.func @transform_11(%arg0: i32, %arg1: i32) -> (i32, i32, i32) {
    %c0_i32 = arith.constant 0 : i32
    %c0_i32_0 = arith.constant 0 : i32
    return %arg0, %arg1, %c0_i32 : i32, i32, i32
  }
}

module attributes {stable_mosaic.version = 11 : i64} {
  func.func @kernel(%arg0: i32, %arg1: i32, %arg2: i32, %arg3: memref<3xi32, #tpu.memory_space<smem>>, %arg4: memref<3xi32, #tpu.memory_space<smem>>, %arg5: memref<1x8x32xbf16, #tpu.memory_space<vmem>>, %arg6: memref<1x8x32xbf16, #tpu.memory_space<vmem>>, %arg7: memref<1x8x32xbf16, #tpu.memory_space<vmem>>, %arg8: memref<1x8x32xbf16, #tpu.memory_space<vmem>>, %arg9: memref<4x8x1xf32, #tpu.memory_space<vmem>>, %arg10: memref<4x8x1xf32, #tpu.memory_space<vmem>>, %arg11: memref<4x8x8xf32, #tpu.memory_space<vmem>>) attributes {dimension_semantics = [#tpu.dimension_semantics<parallel>, #tpu.dimension_semantics<parallel>, #tpu.dimension_semantics<arbitrary>], iteration_bounds = array<i64: 2, 1, 3>, scalar_prefetch = 2 : i64, scratch_operands = 3 : i64, tpu.core_type = #tpu.core_type<tc>, window_params = [{transform_indices = @transform_0, window_bounds = array<i64: 1, 8, 32>}, {transform_indices = @transform_1, window_bounds = array<i64: 1, 8, 32>}, {transform_indices = @transform_2, window_bounds = array<i64: 1, 8, 32>}, {transform_indices = @transform_3, window_bounds = array<i64: 1, 8, 32>}]} {
    %0 = arith.index_cast %arg2 : i32 to index
    %1 = memref.load %arg3[%0] : memref<3xi32, #tpu.memory_space<smem>>
    %2 = arith.index_cast %arg2 : i32 to index
    %3 = memref.load %arg4[%2] : memref<3xi32, #tpu.memory_space<smem>>
    %c0_i32 = arith.constant 0 : i32
    %4 = arith.cmpi eq, %3, %c0_i32 : i32
    %5 = arith.extui %4 : i1 to i32
    %c0_i32_0 = arith.constant 0 : i32
    %6 = arith.cmpi ne, %5, %c0_i32_0 : i32
    scf.if %6 {
      %cst = arith.constant 0xFF800000 : f32
      %19 = vector.broadcast %cst : f32 to vector<4x8x1xf32>
      %c0_11 = arith.constant 0 : index
      %c0_12 = arith.constant 0 : index
      %c0_13 = arith.constant 0 : index
      %20 = vector.load %arg9[%c0_11, %c0_12, %c0_13] : memref<4x8x1xf32, #tpu.memory_space<vmem>>, vector<4x8x1xf32>
      tpu.vector_store %arg9[%c0_11, %c0_12, %c0_13], %19 {strides = array<i32>} : memref<4x8x1xf32, #tpu.memory_space<vmem>>, vector<4x8x1xf32>,
      %cst_14 = arith.constant 0.000000e+00 : f32
      %21 = vector.broadcast %cst_14 : f32 to vector<4x8x1xf32>
      %c0_15 = arith.constant 0 : index
      %c0_16 = arith.constant 0 : index
      %c0_17 = arith.constant 0 : index
      %22 = vector.load %arg10[%c0_15, %c0_16, %c0_17] : memref<4x8x1xf32, #tpu.memory_space<vmem>>, vector<4x8x1xf32>
      tpu.vector_store %arg10[%c0_15, %c0_16, %c0_17], %21 {strides = array<i32>} : memref<4x8x1xf32, #tpu.memory_space<vmem>>, vector<4x8x1xf32>,
      %cst_18 = arith.constant 0.000000e+00 : f32
      %23 = vector.broadcast %cst_18 : f32 to vector<4x8x8xf32>
      %c0_19 = arith.constant 0 : index
      %c0_20 = arith.constant 0 : index
      %c0_21 = arith.constant 0 : index
      %24 = vector.load %arg11[%c0_19, %c0_20, %c0_21] : memref<4x8x8xf32, #tpu.memory_space<vmem>>, vector<4x8x8xf32>
      tpu.vector_store %arg11[%c0_19, %c0_20, %c0_21], %23 {strides = array<i32>} : memref<4x8x8xf32, #tpu.memory_space<vmem>>, vector<4x8x8xf32>,
    } else {
    }
    %c0 = arith.constant 0 : index
    %c0_1 = arith.constant 0 : index
    %c0_2 = arith.constant 0 : index
    %7 = vector.load %arg5[%c0, %c0_1, %c0_2] : memref<1x8x32xbf16, #tpu.memory_space<vmem>>, vector<1x8x32xbf16>
    %8 = vector.shape_cast %7 : vector<1x8x32xbf16> to vector<8x32xbf16>
    %c0_3 = arith.constant 0 : index
    %c0_4 = arith.constant 0 : index
    %c0_5 = arith.constant 0 : index
    %9 = vector.load %arg6[%c0_3, %c0_4, %c0_5] : memref<1x8x32xbf16, #tpu.memory_space<vmem>>, vector<1x8x32xbf16>
    %10 = vector.shape_cast %9 : vector<1x8x32xbf16> to vector<8x32xbf16>
    %c0_6 = arith.constant 0 : index
    %c0_7 = arith.constant 0 : index
    %c0_8 = arith.constant 0 : index
    %11 = vector.load %arg7[%c0_6, %c0_7, %c0_8] : memref<1x8x32xbf16, #tpu.memory_space<vmem>>, vector<1x8x32xbf16>
    %12 = vector.shape_cast %11 : vector<1x8x32xbf16> to vector<8x32xbf16>
    %13 = arith.cmpi slt, %3, %1 : i32
    %14 = arith.extui %13 : i1 to i32
    %c0_i32_9 = arith.constant 0 : i32
    %15 = arith.cmpi ne, %14, %c0_i32_9 : i32
    scf.if %15 {
      %19 = vector.extract_strided_slice %8 {offsets = [0, 0], sizes = [8, 8], strides = [1, 1]} : vector<8x32xbf16> to vector<8x8xbf16>
      %20 = vector.extract_strided_slice %10 {offsets = [0, 0], sizes = [8, 8], strides = [1, 1]} : vector<8x32xbf16> to vector<8x8xbf16>
      %cst = arith.constant dense<0.000000e+00> : vector<8x8xf32>
      %21 = tpu.matmul %19, %20, %cst {dimension_numbers = #tpu.dot_dimension_numbers<[1], [1], [0], [0], [0, 0, 1, 0], [], []>} : vector<8x8xbf16>, vector<8x8xbf16>, vector<8x8xf32> -> vector<8x8xf32>
      %c0_11 = arith.constant 0 : index
      %c0_12 = arith.constant 0 : index
      %c0_13 = arith.constant 0 : index
      %22 = vector.load %arg9[%c0_11, %c0_12, %c0_13] : memref<4x8x1xf32, #tpu.memory_space<vmem>>, vector<1x8x1xf32>
      %23 = vector.shape_cast %22 : vector<1x8x1xf32> to vector<8x1xf32>
      %cst_14 = arith.constant dense<0xFF800000> : vector<8xf32>
      %24 = vector.multi_reduction <maximumf>, %21, %cst_14 [1] : vector<8x8xf32> to vector<8xf32>
      %25 = vector.shape_cast %24 : vector<8xf32> to vector<8x1xf32>
      %26 = arith.maximumf %23, %25 : vector<8x1xf32>
      %27 = arith.subf %23, %26 : vector<8x1xf32>
      %28 = math.exp %27 : vector<8x1xf32>
      %29 = vector.broadcast %26 : vector<8x1xf32> to vector<8x8xf32>
      %30 = arith.subf %21, %29 : vector<8x8xf32>
      %31 = math.exp %30 : vector<8x8xf32>
      %c0_15 = arith.constant 0 : index
      %c0_16 = arith.constant 0 : index
      %c0_17 = arith.constant 0 : index
      %32 = vector.load %arg10[%c0_15, %c0_16, %c0_17] : memref<4x8x1xf32, #tpu.memory_space<vmem>>, vector<1x8x1xf32>
      %33 = vector.shape_cast %32 : vector<1x8x1xf32> to vector<8x1xf32>
      %34 = arith.mulf %28, %33 : vector<8x1xf32>
      %cst_18 = arith.constant dense<0.000000e+00> : vector<8xf32>
      %35 = vector.multi_reduction <add>, %31, %cst_18 [1] : vector<8x8xf32> to vector<8xf32>
      %36 = vector.shape_cast %35 : vector<8xf32> to vector<8x1xf32>
      %37 = arith.addf %34, %36 : vector<8x1xf32>
      %c0_19 = arith.constant 0 : index
      %c0_20 = arith.constant 0 : index
      %c0_21 = arith.constant 0 : index
      %38 = vector.load %arg10[%c0_19, %c0_20, %c0_21] : memref<4x8x1xf32, #tpu.memory_space<vmem>>, vector<1x8x1xf32>
      %39 = vector.shape_cast %38 : vector<1x8x1xf32> to vector<8x1xf32>
      %40 = vector.shape_cast %37 : vector<8x1xf32> to vector<1x8x1xf32>
      tpu.vector_store %arg10[%c0_19, %c0_20, %c0_21], %40 {strides = array<i32>} : memref<4x8x1xf32, #tpu.memory_space<vmem>>, vector<1x8x1xf32>,
      %c0_22 = arith.constant 0 : index
      %c0_23 = arith.constant 0 : index
      %c0_24 = arith.constant 0 : index
      %41 = vector.load %arg11[%c0_22, %c0_23, %c0_24] : memref<4x8x8xf32, #tpu.memory_space<vmem>>, vector<1x8x8xf32>
      %42 = vector.shape_cast %41 : vector<1x8x8xf32> to vector<8x8xf32>
      %43 = vector.broadcast %28 : vector<8x1xf32> to vector<8x8xf32>
      %44 = arith.mulf %43, %42 : vector<8x8xf32>
      %45 = arith.truncf %31 : vector<8x8xf32> to vector<8x8xbf16>
      %46 = vector.extract_strided_slice %12 {offsets = [0, 0], sizes = [8, 8], strides = [1, 1]} : vector<8x32xbf16> to vector<8x8xbf16>
      %cst_25 = arith.constant dense<0.000000e+00> : vector<8x8xf32>
      %47 = tpu.matmul %45, %46, %cst_25 {dimension_numbers = #tpu.dot_dimension_numbers<[1], [0], [0], [1], [0, 0, 1, 1], [], []>} : vector<8x8xbf16>, vector<8x8xbf16>, vector<8x8xf32> -> vector<8x8xf32>
      %48 = arith.addf %44, %47 : vector<8x8xf32>
      %c0_26 = arith.constant 0 : index
      %c0_27 = arith.constant 0 : index
      %c0_28 = arith.constant 0 : index
      %49 = vector.load %arg11[%c0_26, %c0_27, %c0_28] : memref<4x8x8xf32, #tpu.memory_space<vmem>>, vector<1x8x8xf32>
      %50 = vector.shape_cast %49 : vector<1x8x8xf32> to vector<8x8xf32>
      %51 = vector.shape_cast %48 : vector<8x8xf32> to vector<1x8x8xf32>
      tpu.vector_store %arg11[%c0_26, %c0_27, %c0_28], %51 {strides = array<i32>} : memref<4x8x8xf32, #tpu.memory_space<vmem>>, vector<1x8x8xf32>,
      %c0_29 = arith.constant 0 : index
      %c0_30 = arith.constant 0 : index
      %c0_31 = arith.constant 0 : index
      %52 = vector.load %arg9[%c0_29, %c0_30, %c0_31] : memref<4x8x1xf32, #tpu.memory_space<vmem>>, vector<1x8x1xf32>
      %53 = vector.shape_cast %52 : vector<1x8x1xf32> to vector<8x1xf32>
      %54 = vector.shape_cast %26 : vector<8x1xf32> to vector<1x8x1xf32>
      tpu.vector_store %arg9[%c0_29, %c0_30, %c0_31], %54 {strides = array<i32>} : memref<4x8x1xf32, #tpu.memory_space<vmem>>, vector<1x8x1xf32>,
      %55 = vector.extract_strided_slice %8 {offsets = [0, 8], sizes = [8, 8], strides = [1, 1]} : vector<8x32xbf16> to vector<8x8xbf16>
      %56 = vector.extract_strided_slice %10 {offsets = [0, 8], sizes = [8, 8], strides = [1, 1]} : vector<8x32xbf16> to vector<8x8xbf16>
      %cst_32 = arith.constant dense<0.000000e+00> : vector<8x8xf32>
      %57 = tpu.matmul %55, %56, %cst_32 {dimension_numbers = #tpu.dot_dimension_numbers<[1], [1], [0], [0], [0, 0, 1, 0], [], []>} : vector<8x8xbf16>, vector<8x8xbf16>, vector<8x8xf32> -> vector<8x8xf32>
      %c1 = arith.constant 1 : index
      %c0_33 = arith.constant 0 : index
      %c0_34 = arith.constant 0 : index
      %58 = vector.load %arg9[%c1, %c0_33, %c0_34] : memref<4x8x1xf32, #tpu.memory_space<vmem>>, vector<1x8x1xf32>
      %59 = vector.shape_cast %58 : vector<1x8x1xf32> to vector<8x1xf32>
      %cst_35 = arith.constant dense<0xFF800000> : vector<8xf32>
      %60 = vector.multi_reduction <maximumf>, %57, %cst_35 [1] : vector<8x8xf32> to vector<8xf32>
      %61 = vector.shape_cast %60 : vector<8xf32> to vector<8x1xf32>
      %62 = arith.maximumf %59, %61 : vector<8x1xf32>
      %63 = arith.subf %59, %62 : vector<8x1xf32>
      %64 = math.exp %63 : vector<8x1xf32>
      %65 = vector.broadcast %62 : vector<8x1xf32> to vector<8x8xf32>
      %66 = arith.subf %57, %65 : vector<8x8xf32>
      %67 = math.exp %66 : vector<8x8xf32>
      %c1_36 = arith.constant 1 : index
      %c0_37 = arith.constant 0 : index
      %c0_38 = arith.constant 0 : index
      %68 = vector.load %arg10[%c1_36, %c0_37, %c0_38] : memref<4x8x1xf32, #tpu.memory_space<vmem>>, vector<1x8x1xf32>
      %69 = vector.shape_cast %68 : vector<1x8x1xf32> to vector<8x1xf32>
      %70 = arith.mulf %64, %69 : vector<8x1xf32>
      %cst_39 = arith.constant dense<0.000000e+00> : vector<8xf32>
      %71 = vector.multi_reduction <add>, %67, %cst_39 [1] : vector<8x8xf32> to vector<8xf32>
      %72 = vector.shape_cast %71 : vector<8xf32> to vector<8x1xf32>
      %73 = arith.addf %70, %72 : vector<8x1xf32>
      %c1_40 = arith.constant 1 : index
      %c0_41 = arith.constant 0 : index
      %c0_42 = arith.constant 0 : index
      %74 = vector.load %arg10[%c1_40, %c0_41, %c0_42] : memref<4x8x1xf32, #tpu.memory_space<vmem>>, vector<1x8x1xf32>
      %75 = vector.shape_cast %74 : vector<1x8x1xf32> to vector<8x1xf32>
      %76 = vector.shape_cast %73 : vector<8x1xf32> to vector<1x8x1xf32>
      tpu.vector_store %arg10[%c1_40, %c0_41, %c0_42], %76 {strides = array<i32>} : memref<4x8x1xf32, #tpu.memory_space<vmem>>, vector<1x8x1xf32>,
      %c1_43 = arith.constant 1 : index
      %c0_44 = arith.constant 0 : index
      %c0_45 = arith.constant 0 : index
      %77 = vector.load %arg11[%c1_43, %c0_44, %c0_45] : memref<4x8x8xf32, #tpu.memory_space<vmem>>, vector<1x8x8xf32>
      %78 = vector.shape_cast %77 : vector<1x8x8xf32> to vector<8x8xf32>
      %79 = vector.broadcast %64 : vector<8x1xf32> to vector<8x8xf32>
      %80 = arith.mulf %79, %78 : vector<8x8xf32>
      %81 = arith.truncf %67 : vector<8x8xf32> to vector<8x8xbf16>
      %82 = vector.extract_strided_slice %12 {offsets = [0, 8], sizes = [8, 8], strides = [1, 1]} : vector<8x32xbf16> to vector<8x8xbf16>
      %cst_46 = arith.constant dense<0.000000e+00> : vector<8x8xf32>
      %83 = tpu.matmul %81, %82, %cst_46 {dimension_numbers = #tpu.dot_dimension_numbers<[1], [0], [0], [1], [0, 0, 1, 1], [], []>} : vector<8x8xbf16>, vector<8x8xbf16>, vector<8x8xf32> -> vector<8x8xf32>
      %84 = arith.addf %80, %83 : vector<8x8xf32>
      %c1_47 = arith.constant 1 : index
      %c0_48 = arith.constant 0 : index
      %c0_49 = arith.constant 0 : index
      %85 = vector.load %arg11[%c1_47, %c0_48, %c0_49] : memref<4x8x8xf32, #tpu.memory_space<vmem>>, vector<1x8x8xf32>
      %86 = vector.shape_cast %85 : vector<1x8x8xf32> to vector<8x8xf32>
      %87 = vector.shape_cast %84 : vector<8x8xf32> to vector<1x8x8xf32>
      tpu.vector_store %arg11[%c1_47, %c0_48, %c0_49], %87 {strides = array<i32>} : memref<4x8x8xf32, #tpu.memory_space<vmem>>, vector<1x8x8xf32>,
      %c1_50 = arith.constant 1 : index
      %c0_51 = arith.constant 0 : index
      %c0_52 = arith.constant 0 : index
      %88 = vector.load %arg9[%c1_50, %c0_51, %c0_52] : memref<4x8x1xf32, #tpu.memory_space<vmem>>, vector<1x8x1xf32>
      %89 = vector.shape_cast %88 : vector<1x8x1xf32> to vector<8x1xf32>
      %90 = vector.shape_cast %62 : vector<8x1xf32> to vector<1x8x1xf32>
      tpu.vector_store %arg9[%c1_50, %c0_51, %c0_52], %90 {strides = array<i32>} : memref<4x8x1xf32, #tpu.memory_space<vmem>>, vector<1x8x1xf32>,
      %91 = vector.extract_strided_slice %8 {offsets = [0, 16], sizes = [8, 8], strides = [1, 1]} : vector<8x32xbf16> to vector<8x8xbf16>
      %92 = vector.extract_strided_slice %10 {offsets = [0, 16], sizes = [8, 8], strides = [1, 1]} : vector<8x32xbf16> to vector<8x8xbf16>
      %cst_53 = arith.constant dense<0.000000e+00> : vector<8x8xf32>
      %93 = tpu.matmul %91, %92, %cst_53 {dimension_numbers = #tpu.dot_dimension_numbers<[1], [1], [0], [0], [0, 0, 1, 0], [], []>} : vector<8x8xbf16>, vector<8x8xbf16>, vector<8x8xf32> -> vector<8x8xf32>
      %c2 = arith.constant 2 : index
      %c0_54 = arith.constant 0 : index
      %c0_55 = arith.constant 0 : index
      %94 = vector.load %arg9[%c2, %c0_54, %c0_55] : memref<4x8x1xf32, #tpu.memory_space<vmem>>, vector<1x8x1xf32>
      %95 = vector.shape_cast %94 : vector<1x8x1xf32> to vector<8x1xf32>
      %cst_56 = arith.constant dense<0xFF800000> : vector<8xf32>
      %96 = vector.multi_reduction <maximumf>, %93, %cst_56 [1] : vector<8x8xf32> to vector<8xf32>
      %97 = vector.shape_cast %96 : vector<8xf32> to vector<8x1xf32>
      %98 = arith.maximumf %95, %97 : vector<8x1xf32>
      %99 = arith.subf %95, %98 : vector<8x1xf32>
      %100 = math.exp %99 : vector<8x1xf32>
      %101 = vector.broadcast %98 : vector<8x1xf32> to vector<8x8xf32>
      %102 = arith.subf %93, %101 : vector<8x8xf32>
      %103 = math.exp %102 : vector<8x8xf32>
      %c2_57 = arith.constant 2 : index
      %c0_58 = arith.constant 0 : index
      %c0_59 = arith.constant 0 : index
      %104 = vector.load %arg10[%c2_57, %c0_58, %c0_59] : memref<4x8x1xf32, #tpu.memory_space<vmem>>, vector<1x8x1xf32>
      %105 = vector.shape_cast %104 : vector<1x8x1xf32> to vector<8x1xf32>
      %106 = arith.mulf %100, %105 : vector<8x1xf32>
      %cst_60 = arith.constant dense<0.000000e+00> : vector<8xf32>
      %107 = vector.multi_reduction <add>, %103, %cst_60 [1] : vector<8x8xf32> to vector<8xf32>
      %108 = vector.shape_cast %107 : vector<8xf32> to vector<8x1xf32>
      %109 = arith.addf %106, %108 : vector<8x1xf32>
      %c2_61 = arith.constant 2 : index
      %c0_62 = arith.constant 0 : index
      %c0_63 = arith.constant 0 : index
      %110 = vector.load %arg10[%c2_61, %c0_62, %c0_63] : memref<4x8x1xf32, #tpu.memory_space<vmem>>, vector<1x8x1xf32>
      %111 = vector.shape_cast %110 : vector<1x8x1xf32> to vector<8x1xf32>
      %112 = vector.shape_cast %109 : vector<8x1xf32> to vector<1x8x1xf32>
      tpu.vector_store %arg10[%c2_61, %c0_62, %c0_63], %112 {strides = array<i32>} : memref<4x8x1xf32, #tpu.memory_space<vmem>>, vector<1x8x1xf32>,
      %c2_64 = arith.constant 2 : index
      %c0_65 = arith.constant 0 : index
      %c0_66 = arith.constant 0 : index
      %113 = vector.load %arg11[%c2_64, %c0_65, %c0_66] : memref<4x8x8xf32, #tpu.memory_space<vmem>>, vector<1x8x8xf32>
      %114 = vector.shape_cast %113 : vector<1x8x8xf32> to vector<8x8xf32>
      %115 = vector.broadcast %100 : vector<8x1xf32> to vector<8x8xf32>
      %116 = arith.mulf %115, %114 : vector<8x8xf32>
      %117 = arith.truncf %103 : vector<8x8xf32> to vector<8x8xbf16>
      %118 = vector.extract_strided_slice %12 {offsets = [0, 16], sizes = [8, 8], strides = [1, 1]} : vector<8x32xbf16> to vector<8x8xbf16>
      %cst_67 = arith.constant dense<0.000000e+00> : vector<8x8xf32>
      %119 = tpu.matmul %117, %118, %cst_67 {dimension_numbers = #tpu.dot_dimension_numbers<[1], [0], [0], [1], [0, 0, 1, 1], [], []>} : vector<8x8xbf16>, vector<8x8xbf16>, vector<8x8xf32> -> vector<8x8xf32>
      %120 = arith.addf %116, %119 : vector<8x8xf32>
      %c2_68 = arith.constant 2 : index
      %c0_69 = arith.constant 0 : index
      %c0_70 = arith.constant 0 : index
      %121 = vector.load %arg11[%c2_68, %c0_69, %c0_70] : memref<4x8x8xf32, #tpu.memory_space<vmem>>, vector<1x8x8xf32>
      %122 = vector.shape_cast %121 : vector<1x8x8xf32> to vector<8x8xf32>
      %123 = vector.shape_cast %120 : vector<8x8xf32> to vector<1x8x8xf32>
      tpu.vector_store %arg11[%c2_68, %c0_69, %c0_70], %123 {strides = array<i32>} : memref<4x8x8xf32, #tpu.memory_space<vmem>>, vector<1x8x8xf32>,
      %c2_71 = arith.constant 2 : index
      %c0_72 = arith.constant 0 : index
      %c0_73 = arith.constant 0 : index
      %124 = vector.load %arg9[%c2_71, %c0_72, %c0_73] : memref<4x8x1xf32, #tpu.memory_space<vmem>>, vector<1x8x1xf32>
      %125 = vector.shape_cast %124 : vector<1x8x1xf32> to vector<8x1xf32>
      %126 = vector.shape_cast %98 : vector<8x1xf32> to vector<1x8x1xf32>
      tpu.vector_store %arg9[%c2_71, %c0_72, %c0_73], %126 {strides = array<i32>} : memref<4x8x1xf32, #tpu.memory_space<vmem>>, vector<1x8x1xf32>,
      %127 = vector.extract_strided_slice %8 {offsets = [0, 24], sizes = [8, 8], strides = [1, 1]} : vector<8x32xbf16> to vector<8x8xbf16>
      %128 = vector.extract_strided_slice %10 {offsets = [0, 24], sizes = [8, 8], strides = [1, 1]} : vector<8x32xbf16> to vector<8x8xbf16>
      %cst_74 = arith.constant dense<0.000000e+00> : vector<8x8xf32>
      %129 = tpu.matmul %127, %128, %cst_74 {dimension_numbers = #tpu.dot_dimension_numbers<[1], [1], [0], [0], [0, 0, 1, 0], [], []>} : vector<8x8xbf16>, vector<8x8xbf16>, vector<8x8xf32> -> vector<8x8xf32>
      %c3 = arith.constant 3 : index
      %c0_75 = arith.constant 0 : index
      %c0_76 = arith.constant 0 : index
      %130 = vector.load %arg9[%c3, %c0_75, %c0_76] : memref<4x8x1xf32, #tpu.memory_space<vmem>>, vector<1x8x1xf32>
      %131 = vector.shape_cast %130 : vector<1x8x1xf32> to vector<8x1xf32>
      %cst_77 = arith.constant dense<0xFF800000> : vector<8xf32>
      %132 = vector.multi_reduction <maximumf>, %129, %cst_77 [1] : vector<8x8xf32> to vector<8xf32>
      %133 = vector.shape_cast %132 : vector<8xf32> to vector<8x1xf32>
      %134 = arith.maximumf %131, %133 : vector<8x1xf32>
      %135 = arith.subf %131, %134 : vector<8x1xf32>
      %136 = math.exp %135 : vector<8x1xf32>
      %137 = vector.broadcast %134 : vector<8x1xf32> to vector<8x8xf32>
      %138 = arith.subf %129, %137 : vector<8x8xf32>
      %139 = math.exp %138 : vector<8x8xf32>
      %c3_78 = arith.constant 3 : index
      %c0_79 = arith.constant 0 : index
      %c0_80 = arith.constant 0 : index
      %140 = vector.load %arg10[%c3_78, %c0_79, %c0_80] : memref<4x8x1xf32, #tpu.memory_space<vmem>>, vector<1x8x1xf32>
      %141 = vector.shape_cast %140 : vector<1x8x1xf32> to vector<8x1xf32>
      %142 = arith.mulf %136, %141 : vector<8x1xf32>
      %cst_81 = arith.constant dense<0.000000e+00> : vector<8xf32>
      %143 = vector.multi_reduction <add>, %139, %cst_81 [1] : vector<8x8xf32> to vector<8xf32>
      %144 = vector.shape_cast %143 : vector<8xf32> to vector<8x1xf32>
      %145 = arith.addf %142, %144 : vector<8x1xf32>
      %c3_82 = arith.constant 3 : index
      %c0_83 = arith.constant 0 : index
      %c0_84 = arith.constant 0 : index
      %146 = vector.load %arg10[%c3_82, %c0_83, %c0_84] : memref<4x8x1xf32, #tpu.memory_space<vmem>>, vector<1x8x1xf32>
      %147 = vector.shape_cast %146 : vector<1x8x1xf32> to vector<8x1xf32>
      %148 = vector.shape_cast %145 : vector<8x1xf32> to vector<1x8x1xf32>
      tpu.vector_store %arg10[%c3_82, %c0_83, %c0_84], %148 {strides = array<i32>} : memref<4x8x1xf32, #tpu.memory_space<vmem>>, vector<1x8x1xf32>,
      %c3_85 = arith.constant 3 : index
      %c0_86 = arith.constant 0 : index
      %c0_87 = arith.constant 0 : index
      %149 = vector.load %arg11[%c3_85, %c0_86, %c0_87] : memref<4x8x8xf32, #tpu.memory_space<vmem>>, vector<1x8x8xf32>
      %150 = vector.shape_cast %149 : vector<1x8x8xf32> to vector<8x8xf32>
      %151 = vector.broadcast %136 : vector<8x1xf32> to vector<8x8xf32>
      %152 = arith.mulf %151, %150 : vector<8x8xf32>
      %153 = arith.truncf %139 : vector<8x8xf32> to vector<8x8xbf16>
      %154 = vector.extract_strided_slice %12 {offsets = [0, 24], sizes = [8, 8], strides = [1, 1]} : vector<8x32xbf16> to vector<8x8xbf16>
      %cst_88 = arith.constant dense<0.000000e+00> : vector<8x8xf32>
      %155 = tpu.matmul %153, %154, %cst_88 {dimension_numbers = #tpu.dot_dimension_numbers<[1], [0], [0], [1], [0, 0, 1, 1], [], []>} : vector<8x8xbf16>, vector<8x8xbf16>, vector<8x8xf32> -> vector<8x8xf32>
      %156 = arith.addf %152, %155 : vector<8x8xf32>
      %c3_89 = arith.constant 3 : index
      %c0_90 = arith.constant 0 : index
      %c0_91 = arith.constant 0 : index
      %157 = vector.load %arg11[%c3_89, %c0_90, %c0_91] : memref<4x8x8xf32, #tpu.memory_space<vmem>>, vector<1x8x8xf32>
      %158 = vector.shape_cast %157 : vector<1x8x8xf32> to vector<8x8xf32>
      %159 = vector.shape_cast %156 : vector<8x8xf32> to vector<1x8x8xf32>
      tpu.vector_store %arg11[%c3_89, %c0_90, %c0_91], %159 {strides = array<i32>} : memref<4x8x8xf32, #tpu.memory_space<vmem>>, vector<1x8x8xf32>,
      %c3_92 = arith.constant 3 : index
      %c0_93 = arith.constant 0 : index
      %c0_94 = arith.constant 0 : index
      %160 = vector.load %arg9[%c3_92, %c0_93, %c0_94] : memref<4x8x1xf32, #tpu.memory_space<vmem>>, vector<1x8x1xf32>
      %161 = vector.shape_cast %160 : vector<1x8x1xf32> to vector<8x1xf32>
      %162 = vector.shape_cast %134 : vector<8x1xf32> to vector<1x8x1xf32>
      tpu.vector_store %arg9[%c3_92, %c0_93, %c0_94], %162 {strides = array<i32>} : memref<4x8x1xf32, #tpu.memory_space<vmem>>, vector<1x8x1xf32>,
    } else {
    }
    %16 = arith.cmpi eq, %3, %1 : i32
    %17 = arith.extui %16 : i1 to i32
    %c0_i32_10 = arith.constant 0 : i32
    %18 = arith.cmpi ne, %17, %c0_i32_10 : i32
    scf.if %18 {
      %19 = tpu.iota {dimensions = array<i32: 0>} : vector<8x8xi32>
      %20 = tpu.iota {dimensions = array<i32: 1>} : vector<8x8xi32>
      %21 = arith.cmpi sge, %19, %20 : vector<8x8xi32>
      %22 = vector.extract_strided_slice %8 {offsets = [0, 0], sizes = [8, 8], strides = [1, 1]} : vector<8x32xbf16> to vector<8x8xbf16>
      %23 = vector.extract_strided_slice %10 {offsets = [0, 0], sizes = [8, 8], strides = [1, 1]} : vector<8x32xbf16> to vector<8x8xbf16>
      %cst = arith.constant dense<0.000000e+00> : vector<8x8xf32>
      %24 = tpu.matmul %22, %23, %cst {dimension_numbers = #tpu.dot_dimension_numbers<[1], [1], [0], [0], [0, 0, 1, 0], [], []>} : vector<8x8xbf16>, vector<8x8xbf16>, vector<8x8xf32> -> vector<8x8xf32>
      %cst_11 = arith.constant -1.000000e+30 : f32
      %25 = vector.broadcast %cst_11 : f32 to vector<8x8xf32>
      %26 = arith.select %21, %24, %25 : vector<8x8xi1>, vector<8x8xf32>
      %c0_12 = arith.constant 0 : index
      %c0_13 = arith.constant 0 : index
      %c0_14 = arith.constant 0 : index
      %27 = vector.load %arg9[%c0_12, %c0_13, %c0_14] : memref<4x8x1xf32, #tpu.memory_space<vmem>>, vector<1x8x1xf32>
      %28 = vector.shape_cast %27 : vector<1x8x1xf32> to vector<8x1xf32>
      %cst_15 = arith.constant dense<0xFF800000> : vector<8xf32>
      %29 = vector.multi_reduction <maximumf>, %26, %cst_15 [1] : vector<8x8xf32> to vector<8xf32>
      %30 = vector.shape_cast %29 : vector<8xf32> to vector<8x1xf32>
      %31 = arith.maximumf %28, %30 : vector<8x1xf32>
      %32 = arith.subf %28, %31 : vector<8x1xf32>
      %33 = math.exp %32 : vector<8x1xf32>
      %34 = vector.broadcast %31 : vector<8x1xf32> to vector<8x8xf32>
      %35 = arith.subf %26, %34 : vector<8x8xf32>
      %36 = math.exp %35 : vector<8x8xf32>
      %c0_16 = arith.constant 0 : index
      %c0_17 = arith.constant 0 : index
      %c0_18 = arith.constant 0 : index
      %37 = vector.load %arg10[%c0_16, %c0_17, %c0_18] : memref<4x8x1xf32, #tpu.memory_space<vmem>>, vector<1x8x1xf32>
      %38 = vector.shape_cast %37 : vector<1x8x1xf32> to vector<8x1xf32>
      %39 = arith.mulf %33, %38 : vector<8x1xf32>
      %cst_19 = arith.constant dense<0.000000e+00> : vector<8xf32>
      %40 = vector.multi_reduction <add>, %36, %cst_19 [1] : vector<8x8xf32> to vector<8xf32>
      %41 = vector.shape_cast %40 : vector<8xf32> to vector<8x1xf32>
      %42 = arith.addf %39, %41 : vector<8x1xf32>
      %c0_20 = arith.constant 0 : index
      %c0_21 = arith.constant 0 : index
      %c0_22 = arith.constant 0 : index
      %43 = vector.load %arg10[%c0_20, %c0_21, %c0_22] : memref<4x8x1xf32, #tpu.memory_space<vmem>>, vector<1x8x1xf32>
      %44 = vector.shape_cast %43 : vector<1x8x1xf32> to vector<8x1xf32>
      %45 = vector.shape_cast %42 : vector<8x1xf32> to vector<1x8x1xf32>
      tpu.vector_store %arg10[%c0_20, %c0_21, %c0_22], %45 {strides = array<i32>} : memref<4x8x1xf32, #tpu.memory_space<vmem>>, vector<1x8x1xf32>,
      %c0_23 = arith.constant 0 : index
      %c0_24 = arith.constant 0 : index
      %c0_25 = arith.constant 0 : index
      %46 = vector.load %arg11[%c0_23, %c0_24, %c0_25] : memref<4x8x8xf32, #tpu.memory_space<vmem>>, vector<1x8x8xf32>
      %47 = vector.shape_cast %46 : vector<1x8x8xf32> to vector<8x8xf32>
      %48 = vector.broadcast %33 : vector<8x1xf32> to vector<8x8xf32>
      %49 = arith.mulf %48, %47 : vector<8x8xf32>
      %50 = arith.truncf %36 : vector<8x8xf32> to vector<8x8xbf16>
      %51 = vector.extract_strided_slice %12 {offsets = [0, 0], sizes = [8, 8], strides = [1, 1]} : vector<8x32xbf16> to vector<8x8xbf16>
      %cst_26 = arith.constant dense<0.000000e+00> : vector<8x8xf32>
      %52 = tpu.matmul %50, %51, %cst_26 {dimension_numbers = #tpu.dot_dimension_numbers<[1], [0], [0], [1], [0, 0, 1, 1], [], []>} : vector<8x8xbf16>, vector<8x8xbf16>, vector<8x8xf32> -> vector<8x8xf32>
      %53 = arith.addf %49, %52 : vector<8x8xf32>
      %c0_27 = arith.constant 0 : index
      %c0_28 = arith.constant 0 : index
      %c0_29 = arith.constant 0 : index
      %54 = vector.load %arg11[%c0_27, %c0_28, %c0_29] : memref<4x8x8xf32, #tpu.memory_space<vmem>>, vector<1x8x8xf32>
      %55 = vector.shape_cast %54 : vector<1x8x8xf32> to vector<8x8xf32>
      %56 = vector.shape_cast %53 : vector<8x8xf32> to vector<1x8x8xf32>
      tpu.vector_store %arg11[%c0_27, %c0_28, %c0_29], %56 {strides = array<i32>} : memref<4x8x8xf32, #tpu.memory_space<vmem>>, vector<1x8x8xf32>,
      %c0_30 = arith.constant 0 : index
      %c0_31 = arith.constant 0 : index
      %c0_32 = arith.constant 0 : index
      %57 = vector.load %arg9[%c0_30, %c0_31, %c0_32] : memref<4x8x1xf32, #tpu.memory_space<vmem>>, vector<1x8x1xf32>
      %58 = vector.shape_cast %57 : vector<1x8x1xf32> to vector<8x1xf32>
      %59 = vector.shape_cast %31 : vector<8x1xf32> to vector<1x8x1xf32>
      tpu.vector_store %arg9[%c0_30, %c0_31, %c0_32], %59 {strides = array<i32>} : memref<4x8x1xf32, #tpu.memory_space<vmem>>, vector<1x8x1xf32>,
      %c0_33 = arith.constant 0 : index
      %c0_34 = arith.constant 0 : index
      %c0_35 = arith.constant 0 : index
      %60 = vector.load %arg10[%c0_33, %c0_34, %c0_35] : memref<4x8x1xf32, #tpu.memory_space<vmem>>, vector<1x8x1xf32>
      %61 = vector.shape_cast %60 : vector<1x8x1xf32> to vector<8x1xf32>
      %62 = tpu.reciprocal %61 {approx = true} : vector<8x1xf32> -> vector<8x1xf32>
      %c0_36 = arith.constant 0 : index
      %c0_37 = arith.constant 0 : index
      %c0_38 = arith.constant 0 : index
      %63 = vector.load %arg11[%c0_36, %c0_37, %c0_38] : memref<4x8x8xf32, #tpu.memory_space<vmem>>, vector<1x8x8xf32>
      %64 = vector.shape_cast %63 : vector<1x8x8xf32> to vector<8x8xf32>
      %65 = vector.broadcast %62 : vector<8x1xf32> to vector<8x8xf32>
      %66 = arith.mulf %64, %65 : vector<8x8xf32>
      %67 = vector.extract_strided_slice %8 {offsets = [0, 8], sizes = [8, 8], strides = [1, 1]} : vector<8x32xbf16> to vector<8x8xbf16>
      %68 = vector.extract_strided_slice %10 {offsets = [0, 8], sizes = [8, 8], strides = [1, 1]} : vector<8x32xbf16> to vector<8x8xbf16>
      %cst_39 = arith.constant dense<0.000000e+00> : vector<8x8xf32>
      %69 = tpu.matmul %67, %68, %cst_39 {dimension_numbers = #tpu.dot_dimension_numbers<[1], [1], [0], [0], [0, 0, 1, 0], [], []>} : vector<8x8xbf16>, vector<8x8xbf16>, vector<8x8xf32> -> vector<8x8xf32>
      %cst_40 = arith.constant -1.000000e+30 : f32
      %70 = vector.broadcast %cst_40 : f32 to vector<8x8xf32>
      %71 = arith.select %21, %69, %70 : vector<8x8xi1>, vector<8x8xf32>
      %c1 = arith.constant 1 : index
      %c0_41 = arith.constant 0 : index
      %c0_42 = arith.constant 0 : index
      %72 = vector.load %arg9[%c1, %c0_41, %c0_42] : memref<4x8x1xf32, #tpu.memory_space<vmem>>, vector<1x8x1xf32>
      %73 = vector.shape_cast %72 : vector<1x8x1xf32> to vector<8x1xf32>
      %cst_43 = arith.constant dense<0xFF800000> : vector<8xf32>
      %74 = vector.multi_reduction <maximumf>, %71, %cst_43 [1] : vector<8x8xf32> to vector<8xf32>
      %75 = vector.shape_cast %74 : vector<8xf32> to vector<8x1xf32>
      %76 = arith.maximumf %73, %75 : vector<8x1xf32>
      %77 = arith.subf %73, %76 : vector<8x1xf32>
      %78 = math.exp %77 : vector<8x1xf32>
      %79 = vector.broadcast %76 : vector<8x1xf32> to vector<8x8xf32>
      %80 = arith.subf %71, %79 : vector<8x8xf32>
      %81 = math.exp %80 : vector<8x8xf32>
      %c1_44 = arith.constant 1 : index
      %c0_45 = arith.constant 0 : index
      %c0_46 = arith.constant 0 : index
      %82 = vector.load %arg10[%c1_44, %c0_45, %c0_46] : memref<4x8x1xf32, #tpu.memory_space<vmem>>, vector<1x8x1xf32>
      %83 = vector.shape_cast %82 : vector<1x8x1xf32> to vector<8x1xf32>
      %84 = arith.mulf %78, %83 : vector<8x1xf32>
      %cst_47 = arith.constant dense<0.000000e+00> : vector<8xf32>
      %85 = vector.multi_reduction <add>, %81, %cst_47 [1] : vector<8x8xf32> to vector<8xf32>
      %86 = vector.shape_cast %85 : vector<8xf32> to vector<8x1xf32>
      %87 = arith.addf %84, %86 : vector<8x1xf32>
      %c1_48 = arith.constant 1 : index
      %c0_49 = arith.constant 0 : index
      %c0_50 = arith.constant 0 : index
      %88 = vector.load %arg10[%c1_48, %c0_49, %c0_50] : memref<4x8x1xf32, #tpu.memory_space<vmem>>, vector<1x8x1xf32>
      %89 = vector.shape_cast %88 : vector<1x8x1xf32> to vector<8x1xf32>
      %90 = vector.shape_cast %87 : vector<8x1xf32> to vector<1x8x1xf32>
      tpu.vector_store %arg10[%c1_48, %c0_49, %c0_50], %90 {strides = array<i32>} : memref<4x8x1xf32, #tpu.memory_space<vmem>>, vector<1x8x1xf32>,
      %c1_51 = arith.constant 1 : index
      %c0_52 = arith.constant 0 : index
      %c0_53 = arith.constant 0 : index
      %91 = vector.load %arg11[%c1_51, %c0_52, %c0_53] : memref<4x8x8xf32, #tpu.memory_space<vmem>>, vector<1x8x8xf32>
      %92 = vector.shape_cast %91 : vector<1x8x8xf32> to vector<8x8xf32>
      %93 = vector.broadcast %78 : vector<8x1xf32> to vector<8x8xf32>
      %94 = arith.mulf %93, %92 : vector<8x8xf32>
      %95 = arith.truncf %81 : vector<8x8xf32> to vector<8x8xbf16>
      %96 = vector.extract_strided_slice %12 {offsets = [0, 8], sizes = [8, 8], strides = [1, 1]} : vector<8x32xbf16> to vector<8x8xbf16>
      %cst_54 = arith.constant dense<0.000000e+00> : vector<8x8xf32>
      %97 = tpu.matmul %95, %96, %cst_54 {dimension_numbers = #tpu.dot_dimension_numbers<[1], [0], [0], [1], [0, 0, 1, 1], [], []>} : vector<8x8xbf16>, vector<8x8xbf16>, vector<8x8xf32> -> vector<8x8xf32>
      %98 = arith.addf %94, %97 : vector<8x8xf32>
      %c1_55 = arith.constant 1 : index
      %c0_56 = arith.constant 0 : index
      %c0_57 = arith.constant 0 : index
      %99 = vector.load %arg11[%c1_55, %c0_56, %c0_57] : memref<4x8x8xf32, #tpu.memory_space<vmem>>, vector<1x8x8xf32>
      %100 = vector.shape_cast %99 : vector<1x8x8xf32> to vector<8x8xf32>
      %101 = vector.shape_cast %98 : vector<8x8xf32> to vector<1x8x8xf32>
      tpu.vector_store %arg11[%c1_55, %c0_56, %c0_57], %101 {strides = array<i32>} : memref<4x8x8xf32, #tpu.memory_space<vmem>>, vector<1x8x8xf32>,
      %c1_58 = arith.constant 1 : index
      %c0_59 = arith.constant 0 : index
      %c0_60 = arith.constant 0 : index
      %102 = vector.load %arg9[%c1_58, %c0_59, %c0_60] : memref<4x8x1xf32, #tpu.memory_space<vmem>>, vector<1x8x1xf32>
      %103 = vector.shape_cast %102 : vector<1x8x1xf32> to vector<8x1xf32>
      %104 = vector.shape_cast %76 : vector<8x1xf32> to vector<1x8x1xf32>
      tpu.vector_store %arg9[%c1_58, %c0_59, %c0_60], %104 {strides = array<i32>} : memref<4x8x1xf32, #tpu.memory_space<vmem>>, vector<1x8x1xf32>,
      %c1_61 = arith.constant 1 : index
      %c0_62 = arith.constant 0 : index
      %c0_63 = arith.constant 0 : index
      %105 = vector.load %arg10[%c1_61, %c0_62, %c0_63] : memref<4x8x1xf32, #tpu.memory_space<vmem>>, vector<1x8x1xf32>
      %106 = vector.shape_cast %105 : vector<1x8x1xf32> to vector<8x1xf32>
      %107 = tpu.reciprocal %106 {approx = true} : vector<8x1xf32> -> vector<8x1xf32>
      %c1_64 = arith.constant 1 : index
      %c0_65 = arith.constant 0 : index
      %c0_66 = arith.constant 0 : index
      %108 = vector.load %arg11[%c1_64, %c0_65, %c0_66] : memref<4x8x8xf32, #tpu.memory_space<vmem>>, vector<1x8x8xf32>
      %109 = vector.shape_cast %108 : vector<1x8x8xf32> to vector<8x8xf32>
      %110 = vector.broadcast %107 : vector<8x1xf32> to vector<8x8xf32>
      %111 = arith.mulf %109, %110 : vector<8x8xf32>
      %112 = vector.extract_strided_slice %8 {offsets = [0, 16], sizes = [8, 8], strides = [1, 1]} : vector<8x32xbf16> to vector<8x8xbf16>
      %113 = vector.extract_strided_slice %10 {offsets = [0, 16], sizes = [8, 8], strides = [1, 1]} : vector<8x32xbf16> to vector<8x8xbf16>
      %cst_67 = arith.constant dense<0.000000e+00> : vector<8x8xf32>
      %114 = tpu.matmul %112, %113, %cst_67 {dimension_numbers = #tpu.dot_dimension_numbers<[1], [1], [0], [0], [0, 0, 1, 0], [], []>} : vector<8x8xbf16>, vector<8x8xbf16>, vector<8x8xf32> -> vector<8x8xf32>
      %cst_68 = arith.constant -1.000000e+30 : f32
      %115 = vector.broadcast %cst_68 : f32 to vector<8x8xf32>
      %116 = arith.select %21, %114, %115 : vector<8x8xi1>, vector<8x8xf32>
      %c2 = arith.constant 2 : index
      %c0_69 = arith.constant 0 : index
      %c0_70 = arith.constant 0 : index
      %117 = vector.load %arg9[%c2, %c0_69, %c0_70] : memref<4x8x1xf32, #tpu.memory_space<vmem>>, vector<1x8x1xf32>
      %118 = vector.shape_cast %117 : vector<1x8x1xf32> to vector<8x1xf32>
      %cst_71 = arith.constant dense<0xFF800000> : vector<8xf32>
      %119 = vector.multi_reduction <maximumf>, %116, %cst_71 [1] : vector<8x8xf32> to vector<8xf32>
      %120 = vector.shape_cast %119 : vector<8xf32> to vector<8x1xf32>
      %121 = arith.maximumf %118, %120 : vector<8x1xf32>
      %122 = arith.subf %118, %121 : vector<8x1xf32>
      %123 = math.exp %122 : vector<8x1xf32>
      %124 = vector.broadcast %121 : vector<8x1xf32> to vector<8x8xf32>
      %125 = arith.subf %116, %124 : vector<8x8xf32>
      %126 = math.exp %125 : vector<8x8xf32>
      %c2_72 = arith.constant 2 : index
      %c0_73 = arith.constant 0 : index
      %c0_74 = arith.constant 0 : index
      %127 = vector.load %arg10[%c2_72, %c0_73, %c0_74] : memref<4x8x1xf32, #tpu.memory_space<vmem>>, vector<1x8x1xf32>
      %128 = vector.shape_cast %127 : vector<1x8x1xf32> to vector<8x1xf32>
      %129 = arith.mulf %123, %128 : vector<8x1xf32>
      %cst_75 = arith.constant dense<0.000000e+00> : vector<8xf32>
      %130 = vector.multi_reduction <add>, %126, %cst_75 [1] : vector<8x8xf32> to vector<8xf32>
      %131 = vector.shape_cast %130 : vector<8xf32> to vector<8x1xf32>
      %132 = arith.addf %129, %131 : vector<8x1xf32>
      %c2_76 = arith.constant 2 : index
      %c0_77 = arith.constant 0 : index
      %c0_78 = arith.constant 0 : index
      %133 = vector.load %arg10[%c2_76, %c0_77, %c0_78] : memref<4x8x1xf32, #tpu.memory_space<vmem>>, vector<1x8x1xf32>
      %134 = vector.shape_cast %133 : vector<1x8x1xf32> to vector<8x1xf32>
      %135 = vector.shape_cast %132 : vector<8x1xf32> to vector<1x8x1xf32>
      tpu.vector_store %arg10[%c2_76, %c0_77, %c0_78], %135 {strides = array<i32>} : memref<4x8x1xf32, #tpu.memory_space<vmem>>, vector<1x8x1xf32>,
      %c2_79 = arith.constant 2 : index
      %c0_80 = arith.constant 0 : index
      %c0_81 = arith.constant 0 : index
      %136 = vector.load %arg11[%c2_79, %c0_80, %c0_81] : memref<4x8x8xf32, #tpu.memory_space<vmem>>, vector<1x8x8xf32>
      %137 = vector.shape_cast %136 : vector<1x8x8xf32> to vector<8x8xf32>
      %138 = vector.broadcast %123 : vector<8x1xf32> to vector<8x8xf32>
      %139 = arith.mulf %138, %137 : vector<8x8xf32>
      %140 = arith.truncf %126 : vector<8x8xf32> to vector<8x8xbf16>
      %141 = vector.extract_strided_slice %12 {offsets = [0, 16], sizes = [8, 8], strides = [1, 1]} : vector<8x32xbf16> to vector<8x8xbf16>
      %cst_82 = arith.constant dense<0.000000e+00> : vector<8x8xf32>
      %142 = tpu.matmul %140, %141, %cst_82 {dimension_numbers = #tpu.dot_dimension_numbers<[1], [0], [0], [1], [0, 0, 1, 1], [], []>} : vector<8x8xbf16>, vector<8x8xbf16>, vector<8x8xf32> -> vector<8x8xf32>
      %143 = arith.addf %139, %142 : vector<8x8xf32>
      %c2_83 = arith.constant 2 : index
      %c0_84 = arith.constant 0 : index
      %c0_85 = arith.constant 0 : index
      %144 = vector.load %arg11[%c2_83, %c0_84, %c0_85] : memref<4x8x8xf32, #tpu.memory_space<vmem>>, vector<1x8x8xf32>
      %145 = vector.shape_cast %144 : vector<1x8x8xf32> to vector<8x8xf32>
      %146 = vector.shape_cast %143 : vector<8x8xf32> to vector<1x8x8xf32>
      tpu.vector_store %arg11[%c2_83, %c0_84, %c0_85], %146 {strides = array<i32>} : memref<4x8x8xf32, #tpu.memory_space<vmem>>, vector<1x8x8xf32>,
      %c2_86 = arith.constant 2 : index
      %c0_87 = arith.constant 0 : index
      %c0_88 = arith.constant 0 : index
      %147 = vector.load %arg9[%c2_86, %c0_87, %c0_88] : memref<4x8x1xf32, #tpu.memory_space<vmem>>, vector<1x8x1xf32>
      %148 = vector.shape_cast %147 : vector<1x8x1xf32> to vector<8x1xf32>
      %149 = vector.shape_cast %121 : vector<8x1xf32> to vector<1x8x1xf32>
      tpu.vector_store %arg9[%c2_86, %c0_87, %c0_88], %149 {strides = array<i32>} : memref<4x8x1xf32, #tpu.memory_space<vmem>>, vector<1x8x1xf32>,
      %c2_89 = arith.constant 2 : index
      %c0_90 = arith.constant 0 : index
      %c0_91 = arith.constant 0 : index
      %150 = vector.load %arg10[%c2_89, %c0_90, %c0_91] : memref<4x8x1xf32, #tpu.memory_space<vmem>>, vector<1x8x1xf32>
      %151 = vector.shape_cast %150 : vector<1x8x1xf32> to vector<8x1xf32>
      %152 = tpu.reciprocal %151 {approx = true} : vector<8x1xf32> -> vector<8x1xf32>
      %c2_92 = arith.constant 2 : index
      %c0_93 = arith.constant 0 : index
      %c0_94 = arith.constant 0 : index
      %153 = vector.load %arg11[%c2_92, %c0_93, %c0_94] : memref<4x8x8xf32, #tpu.memory_space<vmem>>, vector<1x8x8xf32>
      %154 = vector.shape_cast %153 : vector<1x8x8xf32> to vector<8x8xf32>
      %155 = vector.broadcast %152 : vector<8x1xf32> to vector<8x8xf32>
      %156 = arith.mulf %154, %155 : vector<8x8xf32>
      %157 = vector.extract_strided_slice %8 {offsets = [0, 24], sizes = [8, 8], strides = [1, 1]} : vector<8x32xbf16> to vector<8x8xbf16>
      %158 = vector.extract_strided_slice %10 {offsets = [0, 24], sizes = [8, 8], strides = [1, 1]} : vector<8x32xbf16> to vector<8x8xbf16>
      %cst_95 = arith.constant dense<0.000000e+00> : vector<8x8xf32>
      %159 = tpu.matmul %157, %158, %cst_95 {dimension_numbers = #tpu.dot_dimension_numbers<[1], [1], [0], [0], [0, 0, 1, 0], [], []>} : vector<8x8xbf16>, vector<8x8xbf16>, vector<8x8xf32> -> vector<8x8xf32>
      %cst_96 = arith.constant -1.000000e+30 : f32
      %160 = vector.broadcast %cst_96 : f32 to vector<8x8xf32>
      %161 = arith.select %21, %159, %160 : vector<8x8xi1>, vector<8x8xf32>
      %c3 = arith.constant 3 : index
      %c0_97 = arith.constant 0 : index
      %c0_98 = arith.constant 0 : index
      %162 = vector.load %arg9[%c3, %c0_97, %c0_98] : memref<4x8x1xf32, #tpu.memory_space<vmem>>, vector<1x8x1xf32>
      %163 = vector.shape_cast %162 : vector<1x8x1xf32> to vector<8x1xf32>
      %cst_99 = arith.constant dense<0xFF800000> : vector<8xf32>
      %164 = vector.multi_reduction <maximumf>, %161, %cst_99 [1] : vector<8x8xf32> to vector<8xf32>
      %165 = vector.shape_cast %164 : vector<8xf32> to vector<8x1xf32>
      %166 = arith.maximumf %163, %165 : vector<8x1xf32>
      %167 = arith.subf %163, %166 : vector<8x1xf32>
      %168 = math.exp %167 : vector<8x1xf32>
      %169 = vector.broadcast %166 : vector<8x1xf32> to vector<8x8xf32>
      %170 = arith.subf %161, %169 : vector<8x8xf32>
      %171 = math.exp %170 : vector<8x8xf32>
      %c3_100 = arith.constant 3 : index
      %c0_101 = arith.constant 0 : index
      %c0_102 = arith.constant 0 : index
      %172 = vector.load %arg10[%c3_100, %c0_101, %c0_102] : memref<4x8x1xf32, #tpu.memory_space<vmem>>, vector<1x8x1xf32>
      %173 = vector.shape_cast %172 : vector<1x8x1xf32> to vector<8x1xf32>
      %174 = arith.mulf %168, %173 : vector<8x1xf32>
      %cst_103 = arith.constant dense<0.000000e+00> : vector<8xf32>
      %175 = vector.multi_reduction <add>, %171, %cst_103 [1] : vector<8x8xf32> to vector<8xf32>
      %176 = vector.shape_cast %175 : vector<8xf32> to vector<8x1xf32>
      %177 = arith.addf %174, %176 : vector<8x1xf32>
      %c3_104 = arith.constant 3 : index
      %c0_105 = arith.constant 0 : index
      %c0_106 = arith.constant 0 : index
      %178 = vector.load %arg10[%c3_104, %c0_105, %c0_106] : memref<4x8x1xf32, #tpu.memory_space<vmem>>, vector<1x8x1xf32>
      %179 = vector.shape_cast %178 : vector<1x8x1xf32> to vector<8x1xf32>
      %180 = vector.shape_cast %177 : vector<8x1xf32> to vector<1x8x1xf32>
      tpu.vector_store %arg10[%c3_104, %c0_105, %c0_106], %180 {strides = array<i32>} : memref<4x8x1xf32, #tpu.memory_space<vmem>>, vector<1x8x1xf32>,
      %c3_107 = arith.constant 3 : index
      %c0_108 = arith.constant 0 : index
      %c0_109 = arith.constant 0 : index
      %181 = vector.load %arg11[%c3_107, %c0_108, %c0_109] : memref<4x8x8xf32, #tpu.memory_space<vmem>>, vector<1x8x8xf32>
      %182 = vector.shape_cast %181 : vector<1x8x8xf32> to vector<8x8xf32>
      %183 = vector.broadcast %168 : vector<8x1xf32> to vector<8x8xf32>
      %184 = arith.mulf %183, %182 : vector<8x8xf32>
      %185 = arith.truncf %171 : vector<8x8xf32> to vector<8x8xbf16>
      %186 = vector.extract_strided_slice %12 {offsets = [0, 24], sizes = [8, 8], strides = [1, 1]} : vector<8x32xbf16> to vector<8x8xbf16>
      %cst_110 = arith.constant dense<0.000000e+00> : vector<8x8xf32>
      %187 = tpu.matmul %185, %186, %cst_110 {dimension_numbers = #tpu.dot_dimension_numbers<[1], [0], [0], [1], [0, 0, 1, 1], [], []>} : vector<8x8xbf16>, vector<8x8xbf16>, vector<8x8xf32> -> vector<8x8xf32>
      %188 = arith.addf %184, %187 : vector<8x8xf32>
      %c3_111 = arith.constant 3 : index
      %c0_112 = arith.constant 0 : index
      %c0_113 = arith.constant 0 : index
      %189 = vector.load %arg11[%c3_111, %c0_112, %c0_113] : memref<4x8x8xf32, #tpu.memory_space<vmem>>, vector<1x8x8xf32>
      %190 = vector.shape_cast %189 : vector<1x8x8xf32> to vector<8x8xf32>
      %191 = vector.shape_cast %188 : vector<8x8xf32> to vector<1x8x8xf32>
      tpu.vector_store %arg11[%c3_111, %c0_112, %c0_113], %191 {strides = array<i32>} : memref<4x8x8xf32, #tpu.memory_space<vmem>>, vector<1x8x8xf32>,
      %c3_114 = arith.constant 3 : index
      %c0_115 = arith.constant 0 : index
      %c0_116 = arith.constant 0 : index
      %192 = vector.load %arg9[%c3_114, %c0_115, %c0_116] : memref<4x8x1xf32, #tpu.memory_space<vmem>>, vector<1x8x1xf32>
      %193 = vector.shape_cast %192 : vector<1x8x1xf32> to vector<8x1xf32>
      %194 = vector.shape_cast %166 : vector<8x1xf32> to vector<1x8x1xf32>
      tpu.vector_store %arg9[%c3_114, %c0_115, %c0_116], %194 {strides = array<i32>} : memref<4x8x1xf32, #tpu.memory_space<vmem>>, vector<1x8x1xf32>,
      %c3_117 = arith.constant 3 : index
      %c0_118 = arith.constant 0 : index
      %c0_119 = arith.constant 0 : index
      %195 = vector.load %arg10[%c3_117, %c0_118, %c0_119] : memref<4x8x1xf32, #tpu.memory_space<vmem>>, vector<1x8x1xf32>
      %196 = vector.shape_cast %195 : vector<1x8x1xf32> to vector<8x1xf32>
      %197 = tpu.reciprocal %196 {approx = true} : vector<8x1xf32> -> vector<8x1xf32>
      %c3_120 = arith.constant 3 : index
      %c0_121 = arith.constant 0 : index
      %c0_122 = arith.constant 0 : index
      %198 = vector.load %arg11[%c3_120, %c0_121, %c0_122] : memref<4x8x8xf32, #tpu.memory_space<vmem>>, vector<1x8x8xf32>
      %199 = vector.shape_cast %198 : vector<1x8x8xf32> to vector<8x8xf32>
      %200 = vector.broadcast %197 : vector<8x1xf32> to vector<8x8xf32>
      %201 = arith.mulf %199, %200 : vector<8x8xf32>
      %202 = tpu.concatenate %66, %111, %156, %201 in 1 : vector<8x8xf32>, vector<8x8xf32>, vector<8x8xf32>, vector<8x8xf32> -> vector<8x32xf32>
      %203 = arith.truncf %202 : vector<8x32xf32> to vector<8x32xbf16>
      %c0_123 = arith.constant 0 : index
      %c0_124 = arith.constant 0 : index
      %c0_125 = arith.constant 0 : index
      %204 = vector.load %arg8[%c0_123, %c0_124, %c0_125] : memref<1x8x32xbf16, #tpu.memory_space<vmem>>, vector<1x8x32xbf16>
      %205 = vector.shape_cast %204 : vector<1x8x32xbf16> to vector<8x32xbf16>
      %206 = vector.shape_cast %203 : vector<8x32xbf16> to vector<1x8x32xbf16>
      tpu.vector_store %arg8[%c0_123, %c0_124, %c0_125], %206 {strides = array<i32>} : memref<1x8x32xbf16, #tpu.memory_space<vmem>>, vector<1x8x32xbf16>,
    } else {
    }
    return
  }
  func.func @transform_0(%arg0: i32, %arg1: i32, %arg2: i32, %arg3: memref<3xi32, #tpu.memory_space<smem>>, %arg4: memref<3xi32, #tpu.memory_space<smem>>) -> (i32, i32, i32) {
    %0 = arith.index_cast %arg2 : i32 to index
    %1 = memref.load %arg3[%0] : memref<3xi32, #tpu.memory_space<smem>>
    %c0_i32 = arith.constant 0 : i32
    return %arg0, %1, %arg1 : i32, i32, i32
  }
  func.func @transform_1(%arg0: i32, %arg1: i32, %arg2: i32, %arg3: memref<3xi32, #tpu.memory_space<smem>>, %arg4: memref<3xi32, #tpu.memory_space<smem>>) -> (i32, i32, i32) {
    %0 = arith.index_cast %arg2 : i32 to index
    %1 = memref.load %arg4[%0] : memref<3xi32, #tpu.memory_space<smem>>
    %c0_i32 = arith.constant 0 : i32
    return %arg0, %1, %arg1 : i32, i32, i32
  }
  func.func @transform_2(%arg0: i32, %arg1: i32, %arg2: i32, %arg3: memref<3xi32, #tpu.memory_space<smem>>, %arg4: memref<3xi32, #tpu.memory_space<smem>>) -> (i32, i32, i32) {
    %0 = arith.index_cast %arg2 : i32 to index
    %1 = memref.load %arg4[%0] : memref<3xi32, #tpu.memory_space<smem>>
    %c0_i32 = arith.constant 0 : i32
    return %arg0, %1, %arg1 : i32, i32, i32
  }
  func.func @transform_3(%arg0: i32, %arg1: i32, %arg2: i32, %arg3: memref<3xi32, #tpu.memory_space<smem>>, %arg4: memref<3xi32, #tpu.memory_space<smem>>) -> (i32, i32, i32) {
    %0 = arith.index_cast %arg2 : i32 to index
    %1 = memref.load %arg3[%0] : memref<3xi32, #tpu.memory_space<smem>>
    %c0_i32 = arith.constant 0 : i32
    return %arg0, %1, %arg1 : i32, i32, i32
  }
}

module attributes {stable_mosaic.version = 11 : i64} {
  func.func @_proj_mlp_kernel(%arg0: i32, %arg1: i32, %arg2: memref<1x8x32xf32, #tpu.memory_space<vmem>>, %arg3: memref<1x8x32xbf16, #tpu.memory_space<vmem>>, %arg4: memref<32x32xbf16, #tpu.memory_space<vmem>>, %arg5: memref<1x32xf32, #tpu.memory_space<vmem>>, %arg6: memref<1x32xf32, #tpu.memory_space<vmem>>, %arg7: memref<1x32xf32, #tpu.memory_space<vmem>>, %arg8: memref<32x128xbf16, #tpu.memory_space<vmem>>, %arg9: memref<1x128xf32, #tpu.memory_space<vmem>>, %arg10: memref<128x32xbf16, #tpu.memory_space<vmem>>, %arg11: memref<1x32xf32, #tpu.memory_space<vmem>>, %arg12: memref<1x8x32xf32, #tpu.memory_space<vmem>>) attributes {dimension_semantics = [#tpu.dimension_semantics<parallel>, #tpu.dimension_semantics<parallel>], iteration_bounds = array<i64: 2, 2>, scalar_prefetch = 0 : i64, scratch_operands = 0 : i64, tpu.core_type = #tpu.core_type<tc>, window_params = [{transform_indices = @transform_0, window_bounds = array<i64: 1, 8, 32>}, {transform_indices = @transform_1, window_bounds = array<i64: 1, 8, 32>}, {pipeline_mode = #tpu.pipeline_mode<synchronous>, transform_indices = @transform_2, window_bounds = array<i64: 32, 32>}, {pipeline_mode = #tpu.pipeline_mode<synchronous>, transform_indices = @transform_3, window_bounds = array<i64: 1, 32>}, {pipeline_mode = #tpu.pipeline_mode<synchronous>, transform_indices = @transform_4, window_bounds = array<i64: 1, 32>}, {pipeline_mode = #tpu.pipeline_mode<synchronous>, transform_indices = @transform_5, window_bounds = array<i64: 1, 32>}, {pipeline_mode = #tpu.pipeline_mode<synchronous>, transform_indices = @transform_6, window_bounds = array<i64: 32, 128>}, {pipeline_mode = #tpu.pipeline_mode<synchronous>, transform_indices = @transform_7, window_bounds = array<i64: 1, 128>}, {pipeline_mode = #tpu.pipeline_mode<synchronous>, transform_indices = @transform_8, window_bounds = array<i64: 128, 32>}, {pipeline_mode = #tpu.pipeline_mode<synchronous>, transform_indices = @transform_9, window_bounds = array<i64: 1, 32>}, {transform_indices = @transform_10, window_bounds = array<i64: 1, 8, 32>}]} {
    %c0 = arith.constant 0 : index
    %c0_0 = arith.constant 0 : index
    %c0_1 = arith.constant 0 : index
    %0 = vector.load %arg2[%c0, %c0_0, %c0_1] : memref<1x8x32xf32, #tpu.memory_space<vmem>>, vector<1x8x32xf32>
    %1 = vector.shape_cast %0 : vector<1x8x32xf32> to vector<8x32xf32>
    %c0_2 = arith.constant 0 : index
    %c0_3 = arith.constant 0 : index
    %c0_4 = arith.constant 0 : index
    %2 = vector.load %arg3[%c0_2, %c0_3, %c0_4] : memref<1x8x32xbf16, #tpu.memory_space<vmem>>, vector<1x8x32xbf16>
    %3 = vector.shape_cast %2 : vector<1x8x32xbf16> to vector<8x32xbf16>
    %c0_5 = arith.constant 0 : index
    %c0_6 = arith.constant 0 : index
    %4 = vector.load %arg4[%c0_5, %c0_6] : memref<32x32xbf16, #tpu.memory_space<vmem>>, vector<32x32xbf16>
    %cst = arith.constant dense<0.000000e+00> : vector<8x32xf32>
    %5 = tpu.matmul %3, %4, %cst {dimension_numbers = #tpu.dot_dimension_numbers<[1], [0], [0], [1], [0, 0, 1, 1], [], []>} : vector<8x32xbf16>, vector<32x32xbf16>, vector<8x32xf32> -> vector<8x32xf32>
    %c0_7 = arith.constant 0 : index
    %c0_8 = arith.constant 0 : index
    %6 = vector.load %arg5[%c0_7, %c0_8] : memref<1x32xf32, #tpu.memory_space<vmem>>, vector<1x32xf32>
    %7 = vector.shape_cast %6 : vector<1x32xf32> to vector<32xf32>
    %8 = vector.shape_cast %7 : vector<32xf32> to vector<1x32xf32>
    %9 = vector.broadcast %8 : vector<1x32xf32> to vector<8x32xf32>
    %10 = arith.addf %5, %9 : vector<8x32xf32>
    %11 = arith.addf %1, %10 : vector<8x32xf32>
    %c0_9 = arith.constant 0 : index
    %c0_10 = arith.constant 0 : index
    %12 = vector.load %arg6[%c0_9, %c0_10] : memref<1x32xf32, #tpu.memory_space<vmem>>, vector<1x32xf32>
    %13 = vector.shape_cast %12 : vector<1x32xf32> to vector<32xf32>
    %c0_11 = arith.constant 0 : index
    %c0_12 = arith.constant 0 : index
    %14 = vector.load %arg7[%c0_11, %c0_12] : memref<1x32xf32, #tpu.memory_space<vmem>>, vector<1x32xf32>
    %15 = vector.shape_cast %14 : vector<1x32xf32> to vector<32xf32>
    %cst_13 = arith.constant dense<0.000000e+00> : vector<8xf32>
    %16 = vector.multi_reduction <add>, %11, %cst_13 [1] : vector<8x32xf32> to vector<8xf32>
    %17 = vector.shape_cast %16 : vector<8xf32> to vector<8x1xf32>
    %cst_14 = arith.constant 3.200000e+01 : f32
    %18 = vector.broadcast %cst_14 : f32 to vector<8x1xf32>
    %19 = arith.divf %17, %18 : vector<8x1xf32>
    %20 = vector.broadcast %19 : vector<8x1xf32> to vector<8x32xf32>
    %21 = arith.subf %11, %20 : vector<8x32xf32>
    %22 = arith.mulf %21, %21 : vector<8x32xf32>
    %cst_15 = arith.constant dense<0.000000e+00> : vector<8xf32>
    %23 = vector.multi_reduction <add>, %22, %cst_15 [1] : vector<8x32xf32> to vector<8xf32>
    %24 = vector.shape_cast %23 : vector<8xf32> to vector<8x1xf32>
    %cst_16 = arith.constant 3.200000e+01 : f32
    %25 = vector.broadcast %cst_16 : f32 to vector<8x1xf32>
    %26 = arith.divf %24, %25 : vector<8x1xf32>
    %27 = vector.broadcast %19 : vector<8x1xf32> to vector<8x32xf32>
    %28 = arith.subf %11, %27 : vector<8x32xf32>
    %cst_17 = arith.constant 9.99999974E-6 : f32
    %29 = vector.broadcast %cst_17 : f32 to vector<8x1xf32>
    %30 = arith.addf %26, %29 : vector<8x1xf32>
    %31 = math.rsqrt %30 : vector<8x1xf32>
    %32 = vector.broadcast %31 : vector<8x1xf32> to vector<8x32xf32>
    %33 = arith.mulf %28, %32 : vector<8x32xf32>
    %34 = vector.shape_cast %13 : vector<32xf32> to vector<1x32xf32>
    %35 = vector.broadcast %34 : vector<1x32xf32> to vector<8x32xf32>
    %36 = arith.mulf %33, %35 : vector<8x32xf32>
    %37 = vector.shape_cast %15 : vector<32xf32> to vector<1x32xf32>
    %38 = vector.broadcast %37 : vector<1x32xf32> to vector<8x32xf32>
    %39 = arith.addf %36, %38 : vector<8x32xf32>
    %40 = arith.truncf %39 : vector<8x32xf32> to vector<8x32xbf16>
    %c0_18 = arith.constant 0 : index
    %c0_19 = arith.constant 0 : index
    %41 = vector.load %arg8[%c0_18, %c0_19] : memref<32x128xbf16, #tpu.memory_space<vmem>>, vector<32x128xbf16>
    %cst_20 = arith.constant dense<0.000000e+00> : vector<8x128xf32>
    %42 = tpu.matmul %40, %41, %cst_20 {dimension_numbers = #tpu.dot_dimension_numbers<[1], [0], [0], [1], [0, 0, 1, 1], [], []>} : vector<8x32xbf16>, vector<32x128xbf16>, vector<8x128xf32> -> vector<8x128xf32>
    %c0_21 = arith.constant 0 : index
    %c0_22 = arith.constant 0 : index
    %43 = vector.load %arg9[%c0_21, %c0_22] : memref<1x128xf32, #tpu.memory_space<vmem>>, vector<1x128xf32>
    %44 = vector.shape_cast %43 : vector<1x128xf32> to vector<128xf32>
    %45 = vector.shape_cast %44 : vector<128xf32> to vector<1x128xf32>
    %46 = vector.broadcast %45 : vector<1x128xf32> to vector<8x128xf32>
    %47 = arith.addf %42, %46 : vector<8x128xf32>
    %cst_23 = arith.constant 5.000000e-01 : f32
    %48 = vector.broadcast %cst_23 : f32 to vector<8x128xf32>
    %49 = arith.mulf %48, %47 : vector<8x128xf32>
    %cst_24 = arith.constant 4.471500e-02 : f32
    %50 = vector.broadcast %cst_24 : f32 to vector<8x128xf32>
    %51 = arith.mulf %50, %47 : vector<8x128xf32>
    %52 = arith.mulf %51, %47 : vector<8x128xf32>
    %53 = arith.mulf %52, %47 : vector<8x128xf32>
    %54 = arith.addf %47, %53 : vector<8x128xf32>
    %cst_25 = arith.constant 0.797884583 : f32
    %55 = vector.broadcast %cst_25 : f32 to vector<8x128xf32>
    %56 = arith.mulf %55, %54 : vector<8x128xf32>
    %57 = math.tanh %56 : vector<8x128xf32>
    %cst_26 = arith.constant 1.000000e+00 : f32
    %58 = vector.broadcast %cst_26 : f32 to vector<8x128xf32>
    %59 = arith.addf %58, %57 : vector<8x128xf32>
    %60 = arith.mulf %49, %59 : vector<8x128xf32>
    %61 = arith.truncf %60 : vector<8x128xf32> to vector<8x128xbf16>
    %c0_27 = arith.constant 0 : index
    %c0_28 = arith.constant 0 : index
    %62 = vector.load %arg10[%c0_27, %c0_28] : memref<128x32xbf16, #tpu.memory_space<vmem>>, vector<128x32xbf16>
    %cst_29 = arith.constant dense<0.000000e+00> : vector<8x32xf32>
    %63 = tpu.matmul %61, %62, %cst_29 {dimension_numbers = #tpu.dot_dimension_numbers<[1], [0], [0], [1], [0, 0, 1, 1], [], []>} : vector<8x128xbf16>, vector<128x32xbf16>, vector<8x32xf32> -> vector<8x32xf32>
    %c0_30 = arith.constant 0 : index
    %c0_31 = arith.constant 0 : index
    %64 = vector.load %arg11[%c0_30, %c0_31] : memref<1x32xf32, #tpu.memory_space<vmem>>, vector<1x32xf32>
    %65 = vector.shape_cast %64 : vector<1x32xf32> to vector<32xf32>
    %66 = vector.shape_cast %65 : vector<32xf32> to vector<1x32xf32>
    %67 = vector.broadcast %66 : vector<1x32xf32> to vector<8x32xf32>
    %68 = arith.addf %63, %67 : vector<8x32xf32>
    %69 = arith.addf %11, %68 : vector<8x32xf32>
    %c0_32 = arith.constant 0 : index
    %c0_33 = arith.constant 0 : index
    %c0_34 = arith.constant 0 : index
    %70 = vector.load %arg12[%c0_32, %c0_33, %c0_34] : memref<1x8x32xf32, #tpu.memory_space<vmem>>, vector<1x8x32xf32>
    %71 = vector.shape_cast %70 : vector<1x8x32xf32> to vector<8x32xf32>
    %72 = vector.shape_cast %69 : vector<8x32xf32> to vector<1x8x32xf32>
    tpu.vector_store %arg12[%c0_32, %c0_33, %c0_34], %72 {strides = array<i32>} : memref<1x8x32xf32, #tpu.memory_space<vmem>>, vector<1x8x32xf32>,
    return
  }
  func.func @transform_0(%arg0: i32, %arg1: i32) -> (i32, i32, i32) {
    %c0_i32 = arith.constant 0 : i32
    %c0_i32_0 = arith.constant 0 : i32
    return %arg0, %arg1, %c0_i32 : i32, i32, i32
  }
  func.func @transform_1(%arg0: i32, %arg1: i32) -> (i32, i32, i32) {
    %c0_i32 = arith.constant 0 : i32
    %c0_i32_0 = arith.constant 0 : i32
    return %arg0, %arg1, %c0_i32 : i32, i32, i32
  }
  func.func @transform_2(%arg0: i32, %arg1: i32) -> (i32, i32) {
    %c0_i32 = arith.constant 0 : i32
    %c0_i32_0 = arith.constant 0 : i32
    %c0_i32_1 = arith.constant 0 : i32
    return %c0_i32, %c0_i32_0 : i32, i32
  }
  func.func @transform_3(%arg0: i32, %arg1: i32) -> (i32, i32) {
    %c0_i32 = arith.constant 0 : i32
    %c0_i32_0 = arith.constant 0 : i32
    %c0_i32_1 = arith.constant 0 : i32
    return %c0_i32, %c0_i32_0 : i32, i32
  }
  func.func @transform_4(%arg0: i32, %arg1: i32) -> (i32, i32) {
    %c0_i32 = arith.constant 0 : i32
    %c0_i32_0 = arith.constant 0 : i32
    %c0_i32_1 = arith.constant 0 : i32
    return %c0_i32, %c0_i32_0 : i32, i32
  }
  func.func @transform_5(%arg0: i32, %arg1: i32) -> (i32, i32) {
    %c0_i32 = arith.constant 0 : i32
    %c0_i32_0 = arith.constant 0 : i32
    %c0_i32_1 = arith.constant 0 : i32
    return %c0_i32, %c0_i32_0 : i32, i32
  }
  func.func @transform_6(%arg0: i32, %arg1: i32) -> (i32, i32) {
    %c0_i32 = arith.constant 0 : i32
    %c0_i32_0 = arith.constant 0 : i32
    %c0_i32_1 = arith.constant 0 : i32
    return %c0_i32, %c0_i32_0 : i32, i32
  }
  func.func @transform_7(%arg0: i32, %arg1: i32) -> (i32, i32) {
    %c0_i32 = arith.constant 0 : i32
    %c0_i32_0 = arith.constant 0 : i32
    %c0_i32_1 = arith.constant 0 : i32
    return %c0_i32, %c0_i32_0 : i32, i32
  }
  func.func @transform_8(%arg0: i32, %arg1: i32) -> (i32, i32) {
    %c0_i32 = arith.constant 0 : i32
    %c0_i32_0 = arith.constant 0 : i32
    %c0_i32_1 = arith.constant 0 : i32
    return %c0_i32, %c0_i32_0 : i32, i32
  }
  func.func @transform_9(%arg0: i32, %arg1: i32) -> (i32, i32) {
    %c0_i32 = arith.constant 0 : i32
    %c0_i32_0 = arith.constant 0 : i32
    %c0_i32_1 = arith.constant 0 : i32
    return %c0_i32, %c0_i32_0 : i32, i32
  }
  func.func @transform_10(%arg0: i32, %arg1: i32) -> (i32, i32, i32) {
    %c0_i32 = arith.constant 0 : i32
    %c0_i32_0 = arith.constant 0 : i32
    return %arg0, %arg1, %c0_i32 : i32, i32, i32
  }
}

</mosaic_0001>

<bundles_post_ra>
// kernel: gpt2_block.3
= control target key start
LH: loop header
LB: loop body
LE: loop exit
PB: predicated region body
PF: predicated region fallthrough
CT: control target
= control target key end

     0   :  { %s990_s17 = smov 0   ;;  %s992_s18 = smov 0   ;;  %s1089_s0 = inlined_call_operand.vmem [shape: f32[2,16,32], index: 0, kind: input, shape index: {}]   ;;  %s1090_s1 = inlined_call_operand.vmem [shape: f32[1,32], index: 1, kind: input, shape index: {}]   ;;  %s1091_s2 = inlined_call_operand.vmem [shape: f32[1,32], index: 2, kind: input, shape index: {}]   ;;  %s1092_s3 = inlined_call_operand.vmem [shape: bf16[32,32], index: 3, kind: input, shape index: {}]   ;;  %s1093_s4 = inlined_call_operand.vmem [shape: bf16[32,32], index: 4, kind: input, shape index: {}]   ;;  %s1094_s5 = inlined_call_operand.vmem [shape: bf16[32,32], index: 5, kind: input, shape index: {}]   ;;  %s1095_s6 = inlined_call_operand.vmem [shape: f32[1,32], index: 6, kind: input, shape index: {}]   ;;  %s1096_s7 = inlined_call_operand.vmem [shape: f32[1,32], index: 7, kind: input, shape index: {}]   ;;  %s1097_s8 = inlined_call_operand.vmem [shape: f32[1,32], index: 8, kind: input, shape index: {}]   ;;  %s1098_s9 = inlined_call_operand.vmem [shape: bf16[2,16,32], index: 9, kind: output, shape index: {0}]   ;;  %s1099_s10 = inlined_call_operand.vmem [shape: bf16[2,16,32], index: 10, kind: output, shape index: {1}]   ;;  %s1100_s11 = inlined_call_operand.vmem [shape: bf16[2,16,32], index: 11, kind: output, shape index: {2}]  }
   0x1   :  { %s994_s19 = smov 0   ;;  %s996_s20 = smov 0  }
   0x2   :  { %s998_s21 = smov 0  }
   0x3 LB: > { %s31_s22 = sadd.s32 1, %s919_s19  ;;  %s34_s23 = sadd.s32 1, %s923_s20  ;;  %s927_s21 = sphi %s998_s21, %s22_s21   ;;  %s923_s20 = sphi %s996_s20, %s1104_s20   ;;  %s919_s19 = sphi %s994_s19, %s1103_s19   ;;  %s915_s18 = sphi %s992_s18, %s1102_s18   ;;  %s911_s17 = sphi %s990_s17, %s1101_s17  }
   0x4   : > { %p32_p0 = scmp.ge.s32.totalorder %s31_s22, 2  ;;  %p795_p1 = scmp.ge.s32.totalorder %s927_s21, 1 }
   0x5   : > { %p365_p2 = scmp.lt.s32.totalorder %s927_s21, 5 }
   0x6   : > { %s1106_s22 = smov (%p32_p0, %s31_s22), 0  ;;  %s1108_s23 = smov (!%p32_p0, %s34_s23), %s923_s20 }
   0x7   : > { %p366_p3 = pnand %p795_p1, %p365_p2  ;;  %p36_p4 = scmp.ge.s32.totalorder %s1108_s23, 2 }
   0x8   : > { %p427_p5 = scmp.lt.s32.totalorder (!%p366_p3), %s915_s18, 1  ;;  %p429_p6 = scmp.lt.s32.totalorder (!%p366_p3), %s911_s17, 1 }
   0x9   : > { %s1110_s23 = smov (%p36_p4, %s1108_s23), 0  ;;  %369 = sbr.rel (%p366_p3) target bundleno = 431 (0x1af), region = 56 }
   0xe   : > { %s1112_s18 = smov (!%p427_p5, %s915_s18), 1  ;;  %s1114_s17 = smov (!%p429_p6, %s911_s17), 1  ;;  %vm463_vm0 = vcmask 261120   ;;  %v929_v2 = vmov 32.0   ;;  %v834_v14 = vld [vmem:[%s1092_s3 + $0x8] sm:$0xff]  ;;  %v833_v17 = vld [vmem:[%s1092_s3] sm:$0xff] }
   0xf   : > { %s796_s24 = sshll.u32 %s1112_s18, 1  ;;  %885 = vrcp.f32 %v929_v2  ;;  %v836_v15 = vld [vmem:[%s1093_s4 + $0x8] sm:$0xff]  ;;  %531 = vmatpush.bf16.msra.mxu0 %v834_v14  ;;  %v835_v18 = vld [vmem:[%s1093_s4] sm:$0xff]  ;;  %vm539_vm5 = vcmask 257024  }
  0x10   : > { %s1020_s25 = sadd.s32 %s796_s24, %s1114_s17  ;;  %v838_v16 = vld [vmem:[%s1094_s5 + $0x8] sm:$0xff]  ;;  %567 = vmatpush.bf16.msra.mxu1 %v836_v15  ;;  %v837_v19 = vld [vmem:[%s1094_s5] sm:$0xff] }
  0x11   : > { %s797_s26 = sshll.u32 %s1020_s25, 3  ;;  %602 = vmatpush.bf16.msra.mxu2 %v838_v16  ;;  %v880_v29 = vld [vmem:[%s1090_s1] ss:$0 sm:$0xff]  ;;  %s799_s18 = sshll.u32 %s1020_s25, 2 }
  0x12   : > { %s434_s29 = scalar_lea.vmem %s1089_s0, %s797_s26  ;;  %v881_v32 = vld [vmem:[%s1091_s2] ss:$0 sm:$0xff]  ;;  %s442_s27 = scalar_lea.vmem %s1098_s9, %s799_s18 }
  0x13   : > { %v460_v0 = vld [vmem:[%s434_s29] sm:$0xff]  ;;  %532 = vmatpush.bf16.msra.mxu0 %v833_v17  ;;  %s450_s30 = scalar_lea.vmem %s1099_s10, %s799_s18  ;;  %s458_s15 = scalar_lea.vmem %s1100_s11, %s799_s18 }
  0x14   : > { %v464_v1 = vsel %vm463_vm0, %v460_v0, 0.0  ;;  %568 = vmatpush.bf16.msra.mxu1 %v835_v18  ;;  %v882_v36 = vld [vmem:[%s1095_s6] ss:$0 sm:$0xff] }
  0x15   : > { %465 = vadd.xlane.f32.xlu0 %v464_v1  ;;  %v886_v3 = vpop.eup %885  ;;  %603 = vmatpush.bf16.msra.mxu2 %v837_v19  ;;  %v883_v37 = vld [vmem:[%s1096_s7] ss:$0 sm:$0xff] }
  0x16   : > { %v468_v4 = vmul.f32 32.0, %v886_v3  ;;  %vm472_vm1 = vweird.f32 %v886_v3  ;;  %v884_v44 = vld [vmem:[%s1097_s8] ss:$0 sm:$0xff] }
  0x18   : > { %v469_v5 = vsub.f32 1.0, %v468_v4 }
  0x1a   : > { %v470_v6 = vmul.f32 %v886_v3, %v469_v5 }
  0x1c   : > { %v471_v7 = vadd.f32 %v886_v3, %v470_v6 }
  0x1e   : > { %v473_v8 = vsel %vm472_vm1, %v886_v3, %v471_v7 }
  0x88   : > { %v466_v9 = vpop.xlane.xlu0 %465 }
  0x89   : > { %v474_v10 = vmul.f32 %v473_v8, %v466_v9 }
  0x8b   : > { %v475_v11 = vsub.f32 %v460_v0, %v474_v10 }
  0x8d   : > { %v476_v12 = vmul.f32 %v475_v11, %v475_v11 }
  0x8f   : > { %v477_v13 = vsel %vm463_vm0, %v476_v12, 0.0 }
  0x90   : > { %478 = vadd.xlane.f32.xlu0 %v477_v13 }
 0x103   : > { %v479_v20 = vpop.xlane.xlu0 %478 }
 0x104   : > { %v480_v21 = vmul.f32 %v479_v20, %v473_v8 }
 0x106   : > { %v481_v22 = vadd.f32 1e-05, %v480_v21 }
 0x108   : > { %887 = vrsqrt.f32 %v481_v22  ;;  %vm488_vm3 = vweird.f32 %v481_v22 }
 0x10e   : > { %v888_v23 = vpop.eup %887 }
 0x10f   : > { %v483_v24 = vmul.f32 %v888_v23, %v481_v22  ;;  %vm489_vm2 = vweird.f32 %v888_v23 }
 0x110   : > { %vm490_vm4 = vmor %vm488_vm3, %vm489_vm2 }
 0x111   : > { %v484_v25 = vmul.f32 %v888_v23, %v483_v24 }
 0x113   : > { %v485_v26 = vmul.f32 0.5, %v484_v25 }
 0x115   : > { %v486_v27 = vsub.f32 1.5, %v485_v26 }
 0x117   : > { %v487_v28 = vmul.f32 %v888_v23, %v486_v27 }
 0x119   : > { %v491_v30 = vsel %vm490_vm4, %v888_v23, %v487_v28 }
 0x11a   : > { %v492_v31 = vmul.f32 %v491_v30, %v475_v11 }
 0x11c   : > { %v496_v33 = vmul.f32 %v880_v29, %v492_v31 }
 0x11e   : > { %v500_v34 = vadd.f32 %v881_v32, %v496_v33 }
 0x120   : > { %v501_v35 = vpack.c.bf16 %v500_v34, %v500_v34 }
 0x122   : > { %812 = vmatmul.msk.bf16.vlgmr.msra.gmra.mxu0 %vm463_vm0, %v501_v35  ;;  %821 = vmatmul.msk.bf16.vlgmr.msra.gmra.mxu1 %vm463_vm0, %v501_v35 }
 0x123   : > { %830 = vmatmul.msk.bf16.vlgmr.msra.gmra.mxu2 %vm463_vm0, %v501_v35 }
 0x19f   : > { %v534_v38 = vpop.f32.mrf.mxu0  ;;  %v570_v39 = vpop.f32.mrf.mxu1 }
 0x1a0   : > { %v535_v40 = vadd.f32 %v882_v36, %v534_v38  ;;  %v571_v41 = vadd.f32 %v883_v37, %v570_v39 }
 0x1a2   : > { %v538_v42 = vpack.c.bf16 %v535_v40, %v535_v40  ;;  %v574_v43 = vpack.c.bf16 %v571_v41, %v571_v41 }
 0x1a4   : > { %540 = vst.msk [vmem:[%s442_s27] sm:$0xf] %vm539_vm5, %v538_v42 }
 0x1a5   : > { %575 = vst.msk [vmem:[%s450_s30] sm:$0xf] %vm539_vm5, %v574_v43 }
 0x1a6   : > { %v605_v45 = vpop.f32.mrf.mxu2 }
 0x1a7   : > { %v606_v46 = vadd.f32 %v884_v44, %v605_v45  ;;  %v536_v47 = vpop.f32.mrf.mxu0  ;;  %v572_v48 = vpop.f32.mrf.mxu1 }
 0x1a9   : > { %v609_v49 = vpack.c.bf16 %v606_v46, %v606_v46 }
 0x1ab   : > { %610 = vst.msk [vmem:[%s458_s15] sm:$0xf] %vm539_vm5, %v609_v49 }
 0x1ae   : > { %v607_v50 = vpop.f32.mrf.mxu2 }
 0x1af PF: > { %s22_s21 = sadd.s32 1, %s927_s21   ;;  %s1101_s17 = smov %s919_s19 }
 0x1b0   : > { %p19_p7 = scmp.ge.s32.totalorder %s22_s21, 6   ;;  %s1102_s18 = smov %s923_s20 }
 0x1b1   : > { %s1103_s19 = smov %s1106_s22  ;;  %s1104_s20 = smov %s1110_s23 }
 0x1b2   :  { %21 = sbr.rel (!%p19_p7) target bundleno = 3 (0x3), region = 110 }

// kernel: gpt2_block.5
= control target key start
LH: loop header
LB: loop body
LE: loop exit
PB: predicated region body
PF: predicated region fallthrough
CT: control target
= control target key end

     0   :  { %s1236_s0 = inlined_call_operand.vmem [shape: f32[2,16,32], index: 0, kind: input, shape index: {}]   ;;  %s1237_s1 = inlined_call_operand.vmem [shape: bf16[2,16,32], index: 1, kind: input, shape index: {}]   ;;  %s1238_s2 = inlined_call_operand.vmem [shape: bf16[32,32], index: 2, kind: input, shape index: {}]   ;;  %s1239_s3 = inlined_call_operand.vmem [shape: f32[1,32], index: 3, kind: input, shape index: {}]   ;;  %s1240_s4 = inlined_call_operand.vmem [shape: f32[1,32], index: 4, kind: input, shape index: {}]   ;;  %s1241_s5 = inlined_call_operand.vmem [shape: f32[1,32], index: 5, kind: input, shape index: {}]   ;;  %s1242_s6 = inlined_call_operand.vmem [shape: bf16[32,128], index: 6, kind: input, shape index: {}]   ;;  %s1243_s7 = inlined_call_operand.vmem [shape: f32[1,128], index: 7, kind: input, shape index: {}]   ;;  %s1244_s8 = inlined_call_operand.vmem [shape: bf16[128,32], index: 8, kind: input, shape index: {}]   ;;  %s1245_s9 = inlined_call_operand.vmem [shape: f32[1,32], index: 9, kind: input, shape index: {}]   ;;  %s1246_s10 = inlined_call_operand.hbm [shape: f32[2,16,32], index: 10, kind: output, shape index: {}]  }
   0x1   :  { %1252 = sst [smem:[#allocation11_spill]] %s1238_s2 }
   0x2   :  { %15 = vsyncpa [#allocation3], 0 }
   0x3   :  { %17 = vsyncpa [#allocation3 + $0x1], 0  ;;  %s1050_s13 = smov 0   ;;  %s1052_s14 = smov 0  }
   0x4   :  { %s1054_s15 = smov 0   ;;  %s1056_s16 = smov 0  }
   0x5   :  { %s1058_s17 = smov 0   ;;  %s1060_s18 = smov 0  }
   0x6   :  { %s1062_s19 = smov 0   ;;  %s1064_s20 = smov 0  }
   0x7 LB: > { %1253 = sst [smem:[#allocation5_spill]] %s972_s15  ;;  %s738_s21 = sadd.s32 4294967295, %s992_s20   ;;  %s992_s20 = sphi %s1064_s20, %s23_s20   ;;  %s988_s19 = sphi %s1062_s19, %s1267_s19   ;;  %s984_s18 = sphi %s1060_s18, %s1266_s18   ;;  %s980_s17 = sphi %s1058_s17, %s1265_s17   ;;  %s976_s16 = sphi %s1056_s16, %s1264_s16   ;;  %s972_s15 = sphi %s1054_s15, %s1263_s15   ;;  %s968_s14 = sphi %s1052_s14, %s1269_s14   ;;  %s964_s13 = sphi %s1050_s13, %s1268_s13  }
   0x8   : > { %1254 = sst [smem:[#allocation6_spill]] %s984_s18  ;;  %s739_s22 = sadd.s32 4294967294, %s992_s20  }
   0x9   : > { %1255 = sst [smem:[#allocation7_spill]] %s988_s19  ;;  %s32_s23 = sadd.s32 1, %s984_s18 }
   0xa   : > { %p33_p0 = scmp.ge.s32.totalorder %s32_s23, 2  ;;  %s35_s24 = sadd.s32 1, %s988_s19 }
   0xb   : > { %p278_p1 = scmp.ne.s32.totalorder %s972_s15, %s968_s14  ;;  %p279_p2 = scmp.eq.s32.totalorder %s738_s21, 3 }
   0xc   : > { %s1271_s23 = smov (%p33_p0, %s32_s23), 0  ;;  %s1273_s24 = smov (!%p33_p0, %s35_s24), %s988_s19 }
   0xd   : > { %1256 = sst [smem:[#allocation8_spill]] %s1271_s23  ;;  %s264_s25 = ssub.s32 %s984_s18, %s1271_s23 }
   0xe   : > { %p1101_p3 = por %p279_p2, %p278_p1  ;;  %p37_p4 = scmp.ge.s32.totalorder %s1273_s24, 2 }
   0xf   : > { %p284_p5 = scmp.ne.s32.totalorder %s968_s14, %s964_s13  ;;  %p285_p6 = scmp.eq.s32.totalorder %s739_s22, 3 }
  0x10   : > { %p742_p7 = scmp.ge.s32.totalorder %s992_s20, 1  ;;  %s1275_s24 = smov (%p37_p4, %s1273_s24), 0 }
  0x11   : > { %1258 = sst [smem:[#allocation9_spill]] %s1275_s24  ;;  %p1110_p8 = por %p285_p6, %p284_p5 }
  0x12   : > { %p349_p9 = scmp.lt.s32.totalorder %s992_s20, 5  ;;  %s263_s28 = ssub.s32 %s988_s19, %s1275_s24 }
  0x13   : > { %s268_s29 = sadd.s32 1, %s972_s15  ;;  %s265_s30 = sor.u32 %s264_s25, %s263_s28 }
  0x14   : > { %p350_p10 = pnand %p742_p7, %p349_p9  ;;  %p266_p11 = scmp.eq.s32.totalorder %s265_s30, 0 }
  0x15   : > { %s1261_s2 = sld [smem:[#allocation11_spill]] (!%p350_p10)  ;;  %p398_p12 = scmp.lt.s32.totalorder (!%p350_p10), %s980_s17, 1 }
  0x16   : > { %s1119_s11 = scalar_select %p266_p11, %s972_s15, %s268_s29  }
  0x17   : > { %353 = sbr.rel (%p350_p10) target bundleno = 727 (0x2d7), region = 60  ;;  %p400_p13 = scmp.lt.s32.totalorder (!%p350_p10), %s976_s16, 1 }
  0x18   : > { %1260 = sst [smem:[#allocation10_spill]] %s1119_s11  ;;  %s395_s22 = sand.u32 (!%p350_p10), 1, %s968_s14  }
  0x19   : > { %s743_s15 = sshll.u32 (!%p350_p10), %s395_s22, 3 }
  0x1c   : > { %v804_v0 = vld [vmem:[%s1261_s2 + $0x8] sm:$0xff]  ;;  %v803_v1 = vld [vmem:[%s1261_s2] sm:$0xff]  ;;  %s399_s25 = scalar_select %p398_p12, %s980_s17, 1  ;;  %vm437_vm0 = vcmask 261120   ;;  %v994_v10 = vmov 32.0   ;;  %v814_v24 = vld [vmem:[%s1244_s8 + $0x38] sm:$0xff] }
  0x1d   : > { %447 = vmatpush.bf16.msra.mxu0 %v804_v0  ;;  %s401_s28 = scalar_select %p400_p13, %s976_s16, 1  ;;  %v887_v3 = vld [vmem:[%s1239_s3] ss:$0 sm:$0xff]  ;;  %892 = vrcp.f32 %v994_v10  ;;  %v806_v22 = vld [vmem:[%s1242_s6 + $0x8] sm:$0xff]  ;;  %609 = vmatpush.bf16.msra.mxu2 %v814_v24  ;;  %v813_v27 = vld [vmem:[%s1244_s8 + $0x30] sm:$0xff] }
  0x1e   : > { %s744_s29 = sshll.u32 %s399_s25, 1  ;;  %524 = vmatpush.bf16.msra.mxu1 %v806_v22  ;;  %v805_v23 = vld [vmem:[%s1242_s6] sm:$0xff]  ;;  %v812_v42 = vld [vmem:[%s1244_s8 + $0x28] sm:$0xff]  ;;  %v810_v44 = vld [vmem:[%s1244_s8 + $0x18] sm:$0xff] }
  0x1f   : > { %s403_s30 = sadd.s32 %s744_s29, %s401_s28  ;;  %v888_v35 = vld [vmem:[%s1240_s4] ss:$0 sm:$0xff]  ;;  %v809_v45 = vld [vmem:[%s1244_s8 + $0x10] sm:$0xff]  ;;  %v808_v46 = vld [vmem:[%s1244_s8 + $0x8] sm:$0xff]  ;;  %s397_s29 = scalar_lea.vmem [#allocation2], %s743_s15 }
  0x20   : > { %s747_s23 = sshll.u32 %s403_s30, 2  ;;  %s745_s18 = sshll.u32 %s403_s30, 3  ;;  %v889_v38 = vld [vmem:[%s1241_s5] ss:$0 sm:$0xff] }
  0x21   : > { %448 = vmatpush.bf16.msra.mxu0 %v803_v1  ;;  %s413_s19 = scalar_lea.vmem %s1237_s1, %s747_s23  ;;  %s405_s24 = scalar_lea.vmem %s1236_s0, %s745_s18  ;;  %610 = vmatpush.bf16.msra.mxu2 %v813_v27  ;;  %v811_v43 = vld [vmem:[%s1244_s8 + $0x20] sm:$0xff] }
  0x22   : > { %v416_v2 = vld [vmem:[%s413_s19] sm:$0xf]  ;;  %525 = vmatpush.bf16.msra.mxu1 %v805_v23  ;;  %s639_s30 = sshll.u32 %s397_s29, 4  ;;  %s918_s15 = scalar_lea.hbm %s1246_s10, 32  ;;  %s640_s30 = int_to_ptr.vmem [resolvable:$true] %s639_s30 }
  0x23   : > { %v415_v4 = vld [vmem:[%s405_s24] sm:$0xff]  ;;  %v893_v11 = vpop.eup %892  ;;  %s799_s24 = sshll.u32 %s980_s17, 1 }
  0x24   : > { %756 = vmatmul.msk.bf16.vlgmr.msra.gmra.mxu0 %vm437_vm0, %v416_v2  ;;  %v461_v12 = vmul.f32 32.0, %v893_v11  ;;  %vm465_vm1 = vweird.f32 %v893_v11  ;;  %v807_v47 = vld [vmem:[%s1244_s8] sm:$0xff]  ;;  %s635_s2 = sadd.s32 %s976_s16, %s799_s24  ;;  %s625_s16 = scalar_lea.sflag [#allocation3], %s395_s22 }
  0x25   : > { %611 = vmatpush.bf16.msra.mxu2 %v812_v42  ;;  %v890_v48 = vld [vmem:[%s1243_s7] ss:$0 sm:$0xff]  ;;  %s800_s18 = sshll.u32 %s635_s2, 3 }
  0x26   : > { %v462_v13 = vsub.f32 1.0, %v461_v12  ;;  %v891_v62 = vld [vmem:[%s1245_s9] ss:$0 sm:$0xff]  ;;  %s637_s28 = scalar_lea.hbm %s1246_s10, %s800_s18 }
  0x27   : > { %s641_s12 = sshll.u32 %s637_s28, 4  ;;  %s642_s12 = int_to_ptr.hbm [resolvable:$true] %s641_s12 }
  0x28   : > { %v463_v14 = vmul.f32 %v893_v11, %v462_v13  ;;  %s912_s17 = sshra.s32 %s642_s12, 4  ;;  %s913_s17 = int_to_ptr.hbm [resolvable:$true] %s912_s17 }
  0x29   : > { %612 = vmatpush.bf16.msra.mxu2 %v811_v43  ;;  %s914_s21 = scalar_lea.hbm %s913_s17, 8  ;;  %p919_p4 = scmp.lt.s32.totalorder %s913_s17, %s1246_s10 }
  0x2a   : > { %v464_v15 = vadd.f32 %v893_v11, %v463_v14  ;;  %p915_p0 = scmp.ne.s32.totalorder %s913_s17, %s914_s21  ;;  %p920_p5 = scmp.lt.s32.totalorder %s918_s15, %s914_s21 }
  0x2c   : > { %v466_v16 = vsel %vm465_vm1, %v893_v11, %v464_v15  ;;  %p916_p1 = pnand %p915_p0, %p1101_p3  ;;  %p921_p6 = por %p920_p5, %p919_p4 }
  0x2d   : > { %613 = vmatpush.bf16.msra.mxu2 %v810_v44 }
  0x2e   : > { %p917_p2 = pneg %p916_p1 }
  0x30   : > { %p922_p7 = pnand %p921_p6, %p917_p2 }
  0x31   : > { %614 = vmatpush.bf16.msra.mxu2 %v809_v45 }
  0x35   : > { %615 = vmatpush.bf16.msra.mxu2 %v808_v46 }
  0x39   : > { %616 = vmatpush.bf16.msra.mxu2 %v807_v47 }
  0xa1   : > { %v450_v5 = vpop.f32.mrf.mxu0 }
  0xa2   : > { %v451_v6 = vadd.f32 %v887_v3, %v450_v5 }
  0xa4   : > { %v1141_v7 = vadd.f32 %v451_v6, %v415_v4 }
  0xa6   : > { %v457_v8 = vsel %vm437_vm0, %v1141_v7, 0.0 }
  0xa7   : > { %458 = vadd.xlane.f32.xlu0 %v457_v8 }
  0xa9   : > { %v452_v9 = vpop.f32.mrf.mxu0 }
 0x11a   : > { %v459_v17 = vpop.xlane.xlu0 %458 }
 0x11b   : > { %v467_v18 = vmul.f32 %v466_v16, %v459_v17 }
 0x11d   : > { %v468_v19 = vsub.f32 %v1141_v7, %v467_v18 }
 0x11f   : > { %v469_v20 = vmul.f32 %v468_v19, %v468_v19 }
 0x121   : > { %v470_v21 = vsel %vm437_vm0, %v469_v20, 0.0 }
 0x122   : > { %471 = vadd.xlane.f32.xlu0 %v470_v21 }
 0x195   : > { %v472_v25 = vpop.xlane.xlu0 %471 }
 0x196   : > { %v473_v26 = vmul.f32 %v472_v25, %v466_v16 }
 0x198   : > { %v474_v28 = vadd.f32 1e-05, %v473_v26 }
 0x19a   : > { %894 = vrsqrt.f32 %v474_v28  ;;  %vm481_vm3 = vweird.f32 %v474_v28 }
 0x1a0   : > { %v895_v29 = vpop.eup %894 }
 0x1a1   : > { %v476_v30 = vmul.f32 %v895_v29, %v474_v28  ;;  %vm482_vm2 = vweird.f32 %v895_v29 }
 0x1a2   : > { %vm483_vm4 = vmor %vm481_vm3, %vm482_vm2 }
 0x1a3   : > { %v477_v31 = vmul.f32 %v895_v29, %v476_v30 }
 0x1a5   : > { %v478_v32 = vmul.f32 0.5, %v477_v31 }
 0x1a7   : > { %v479_v33 = vsub.f32 1.5, %v478_v32 }
 0x1a9   : > { %v480_v34 = vmul.f32 %v895_v29, %v479_v33 }
 0x1ab   : > { %v484_v36 = vsel %vm483_vm4, %v895_v29, %v480_v34 }
 0x1ac   : > { %v485_v37 = vmul.f32 %v484_v36, %v468_v19 }
 0x1ae   : > { %v489_v39 = vmul.f32 %v888_v35, %v485_v37 }
 0x1b0   : > { %v493_v40 = vadd.f32 %v889_v38, %v489_v39 }
 0x1b2   : > { %v494_v41 = vpack.c.bf16 %v493_v40, %v493_v40 }
 0x1b4   : > { %765 = vmatmul.msk.bf16.vlgmr.msra.gmra.mxu1 %vm437_vm0, %v494_v41 }
 0x231   : > { %v527_v49 = vpop.f32.mrf.mxu1 }
 0x232   : > { %v528_v50 = vadd.f32 %v890_v48, %v527_v49 }
 0x234   : > { %v532_v51 = vmul.f32 0.044715, %v528_v50  ;;  %v531_v58 = vmul.f32 0.5, %v528_v50 }
 0x236   : > { %v533_v52 = vmul.f32 %v532_v51, %v528_v50 }
 0x238   : > { %v534_v53 = vmul.f32 %v533_v52, %v528_v50 }
 0x239   : > { %v529_v54 = vpop.f32.mrf.mxu1 }
 0x23a   : > { %v535_v55 = vadd.f32 %v534_v53, %v528_v50 }
 0x23c   : > { %v536_v56 = vmul.f32 0.7978846, %v535_v55 }
 0x23e   : > { %896 = vtanh.f32 %v536_v56 }
 0x244   : > { %v897_v57 = vpop.eup %896 }
 0x245   : > { %v538_v59 = vadd.f32 1.0, %v897_v57 }
 0x247   : > { %v539_v60 = vmul.f32 %v538_v59, %v531_v58 }
 0x249   : > { %v540_v61 = vpack.c.bf16 %v539_v60, %v539_v60 }
 0x24b   : > { %617 = vmatmul.bf16.vlgmr.msra.gmra.mxu2 %v540_v61 }
 0x2ce   : > { %v618_v63 = vpop.f32.mrf.mxu2 }
 0x2cf   : > { %v619_v0 = vadd.f32 %v891_v62, %v618_v63 }
 0x2d1   : > { %v622_v1 = vadd.f32 %v619_v0, %v1141_v7 }
 0x2d3   : > { %623 = vst.msk [vmem:[%s397_s29] sm:$0xff] %vm437_vm0, %v622_v1 }
 0x2d4   : > { %925 = shalt.err (!%p922_p7)
}
 0x2d5   : > { %815 = dma.vmem_to_hbm [thread:$0]  (%p1101_p3), %s640_s30, 128, %s642_s12, %s625_s16  }
 0x2d6   : > { %v620_v2 = vpop.f32.mrf.mxu2 }
 0x2d7 PF: > { %p821_p9 = scmp.ge.s32.totalorder %s992_s20, 2  ;;  %s653_s22 = sand.u32 1, %s964_s13  }
 0x2d8   : > { %s654_s23 = scalar_lea.sflag [#allocation3], %s653_s22 }
 0x2d9   : > { %p818_p10 = pnand %p821_p9, %p1110_p8 }
 0x2db   : > { %p819_p11 = pneg %p818_p10 }
 0x2dd   : > { %959 = dma.done.wait (%p819_p11), %s654_s23, 128  }
 0x2de   : > { %961 = vsyncadd (%p819_p11), %s654_s23, 4294967168  ;;  %s23_s20 = sadd.s32 1, %s992_s20   ;;  %s1262_s11 = sld [smem:[#allocation5_spill]] }
 0x2df   : > { %p20_p12 = scmp.ge.s32.totalorder %s23_s20, 6   ;;  %s1263_s15 = sld [smem:[#allocation10_spill]] }
 0x2e0   : > { %s1264_s16 = sld [smem:[#allocation6_spill]]  ;;  %s1268_s13 = smov %s968_s14 }
 0x2e1   : > { %s1265_s17 = sld [smem:[#allocation7_spill]]  ;;  %22 = sbr.rel (!%p20_p12) target bundleno = 7 (0x7), region = 98 }
 0x2e2   : > { %s1266_s18 = sld [smem:[#allocation8_spill]] }
 0x2e3   : > { %s1267_s19 = sld [smem:[#allocation9_spill]] }
 0x2e4   : > { %s1269_s14 = smov %s1262_s11 }
 0x2e6   :  { %660 = vsyncpa [#allocation3], 1 }
 0x2e7   :  { %662 = vsyncpa [#allocation3 + $0x1], 1 }

// kernel: gpt2_block.4
= control target key start
LH: loop header
LB: loop body
LE: loop exit
PB: predicated region body
PF: predicated region fallthrough
CT: control target
= control target key end

     0   :  { %s1453_s24 = smov [#allocation6]   ;;  %s1454_s25 = smov [#allocation7]   ;;  %s1788_s0 = inlined_call_operand.vmem [shape: s32[3], index: 0, kind: input, shape index: {}]   ;;  %s1789_s2 = inlined_call_operand.vmem [shape: bf16[2,16,32], index: 2, kind: input, shape index: {}]   ;;  %s1790_s3 = inlined_call_operand.vmem [shape: bf16[2,16,32], index: 3, kind: input, shape index: {}]   ;;  %s1791_s4 = inlined_call_operand.vmem [shape: bf16[2,16,32], index: 4, kind: input, shape index: {}]   ;;  %s1792_s5 = inlined_call_operand.vmem [shape: bf16[2,16,32], index: 5, kind: output, shape index: {}]   ;;  %s1793_s1 = inlined_call_operand.vmem [shape: s32[3], index: 1, kind: input, shape index: {}]  }
   0x1   :  { %s11_s20 = sshll.u32 %s1788_s0, 4  ;;  %s16_s23 = sshll.u32 %s1793_s1, 4  ;;  %s12_s20 = int_to_ptr.vmem [resolvable:$true] %s11_s20  ;;  %s17_s23 = int_to_ptr.vmem [resolvable:$true] %s16_s23 }
   0x2   :  { %14 = dma.vmem_to_smem %s12_s20, 16, %s1453_s24, [#allocation5] }
   0x3   :  { %19 = dma.vmem_to_smem %s17_s23, 16, %s1454_s25, [#allocation5] }
   0x4   :  { %1431 = dma.done.wait [#allocation5], 32 }
   0x5   :  { %1432 = vsyncadd [#allocation5], 4294967264 }
   0x6   :  { %22 = sfence }
   0x7   :  { %s1504_s26 = smov 0   ;;  %s1506_s27 = smov 0  }
   0x8   :  { %s1508_s28 = smov 0   ;;  %s1510_s0 = smov 0  }
   0x9   :  { %s1512_s29 = smov 0  }
   0xa LB: > { %s40_s1 = sadd.s32 1, %s1443_s28  ;;  %s47_s30 = sadd.s32 1, %s1447_s0  ;;  %s1451_s29 = sphi %s1512_s29, %s28_s29   ;;  %s1447_s0 = sphi %s1510_s0, %s1797_s0   ;;  %s1443_s28 = sphi %s1508_s28, %s1796_s28   ;;  %s1439_s27 = sphi %s1506_s27, %s1795_s27   ;;  %s1435_s26 = sphi %s1504_s26, %s1794_s26  }
   0xb   : > { %p41_p0 = scmp.ge.s32.totalorder %s40_s1, 3  ;;  %p1256_p1 = scmp.ge.s32.totalorder %s1451_s29, 1 }
   0xc   : > { %p239_p2 = scmp.lt.s32.totalorder %s1451_s29, 7 }
   0xd   : > { %s1799_s1 = smov (%p41_p0, %s40_s1), 0  ;;  %s1801_s30 = smov (!%p41_p0, %s47_s30), %s1447_s0 }
   0xe   : > { %p240_p3 = pnand %p1256_p1, %p239_p2  ;;  %p49_p4 = scmp.ge.s32.totalorder %s1801_s30, 2 }
   0xf   : > { %s301_s6 = sld [smem:[#allocation6 + %s1435_s26]] (!%p240_p3)  ;;  %p302_p5 = scmp.lt.s32.totalorder (!%p240_p3), %s1439_s27, 1 }
  0x10   : > { %s1803_s30 = smov (%p49_p4, %s1801_s30), 0  ;;  %243 = sbr.rel (%p240_p3) target bundleno = 2095 (0x82f), region = 32 }
  0x11   : > { %s314_s7 = sld [smem:[#allocation7 + %s1435_s26]] (!%p240_p3) }
  0x12   : > { %s327_s8 = sld [smem:[#allocation7 + %s1435_s26]] (!%p240_p3) }
  0x13   : > { %s340_s9 = sld [smem:[#allocation6 + %s1435_s26]] (!%p240_p3) }
  0x14   : > { %s1534_s10 = sld [smem:[#allocation6 + %s1435_s26]] (!%p240_p3) }
  0x15   : > { %s1805_s27 = smov (!%p302_p5, %s1439_s27), 1  ;;  %p304_p6 = scmp.lt.s32.totalorder %s301_s6, 1 }
  0x16   : > { %s1536_s11 = sld [smem:[#allocation7 + %s1435_s26]]  ;;  %s1257_s12 = sshll.u32 %s1805_s27, 1 }
  0x17   : > { %p317_p7 = scmp.lt.s32.totalorder %s314_s7, 1  ;;  %s1807_s6 = smov (!%p304_p6, %s301_s6), 1 }
  0x18   : > { %s310_s13 = sadd.s32 %s1257_s12, %s1807_s6  ;;  %p330_p8 = scmp.lt.s32.totalorder %s327_s8, 1 }
  0x19   : > { %s1809_s7 = smov (!%p317_p7, %s314_s7), 1  ;;  %s1538_s14 = sshll.u32 %s310_s13, 2 }
  0x1a   : > { %s323_s15 = sadd.s32 %s1257_s12, %s1809_s7  ;;  %s312_s18 = scalar_lea.vmem %s1789_s2, %s1538_s14 }
  0x1b   : > { %s1544_s19 = sshll.u32 %s323_s15, 2  ;;  %p343_p9 = scmp.lt.s32.totalorder %s340_s9, 1 }
  0x1c   : > { %s325_s22 = scalar_lea.vmem %s1790_s3, %s1544_s19  ;;  %s1811_s8 = smov (!%p330_p8, %s327_s8), 1 }
  0x1d   : > { %s1813_s9 = smov (!%p343_p9, %s340_s9), 1  ;;  %s336_s23 = sadd.s32 %s1257_s12, %s1811_s8 }
  0x1e   : > { %s1262_s24 = sshll.u32 %s336_s23, 2  ;;  %s349_s25 = sadd.s32 %s1257_s12, %s1813_s9 }
  0x1f   : > { %s338_s6 = scalar_lea.vmem %s1791_s4, %s1262_s24  ;;  %s1553_s7 = sshll.u32 %s349_s25, 2 }
  0x20   : > { %s351_s16 = scalar_lea.vmem %s1792_s5, %s1553_s7  ;;  %p1265_p10 = scmp.ne.s32.totalorder %s1536_s11, 0 }
  0x22   : > { %359 = sbr.rel (%p1265_p10) target bundleno = 52 (0x34), region = 36 }
  0x27   : > { %vm360_vm0 = vcmask 7168   ;;  %v1455_v0 = vmov -inf   ;;  %v1456_v1 = vmov 0.0   ;;  %vm369_vm1 = vcmask 64512  }
  0x28   : > { %361 = vst.msk [vmem:[#allocation2] sm:$0xff] %vm360_vm0, %v1455_v0 }
  0x29   : > { %362 = vst.msk [vmem:[#allocation2 + $0x8] sm:$0xff] %vm360_vm0, %v1455_v0 }
  0x2a   : > { %363 = vst.msk [vmem:[#allocation2 + $0x10] sm:$0xff] %vm360_vm0, %v1455_v0 }
  0x2b   : > { %364 = vst.msk [vmem:[#allocation2 + $0x18] sm:$0xff] %vm360_vm0, %v1455_v0 }
  0x2c   : > { %365 = vst.msk [vmem:[#allocation3] sm:$0xff] %vm360_vm0, %v1456_v1 }
  0x2d   : > { %366 = vst.msk [vmem:[#allocation3 + $0x8] sm:$0xff] %vm360_vm0, %v1456_v1 }
  0x2e   : > { %367 = vst.msk [vmem:[#allocation3 + $0x10] sm:$0xff] %vm360_vm0, %v1456_v1 }
  0x2f   : > { %368 = vst.msk [vmem:[#allocation3 + $0x18] sm:$0xff] %vm360_vm0, %v1456_v1 }
  0x30   : > { %370 = vst.msk [vmem:[#allocation4] sm:$0xff] %vm369_vm1, %v1456_v1 }
  0x31   : > { %371 = vst.msk [vmem:[#allocation4 + $0x8] sm:$0xff] %vm369_vm1, %v1456_v1 }
  0x32   : > { %372 = vst.msk [vmem:[#allocation4 + $0x10] sm:$0xff] %vm369_vm1, %v1456_v1 }
  0x33   : > { %373 = vst.msk [vmem:[#allocation4 + $0x18] sm:$0xff] %vm369_vm1, %v1456_v1 }
  0x34 PF: > { %v1565_v2 = vld [vmem:[%s312_s18] sm:$0xf]  ;;  %p1266_p11 = scmp.ge.s32.totalorder %s1536_s11, %s1534_s10 }
  0x35   : > { %v1572_v3 = vld [vmem:[%s325_s22] sm:$0xf]  ;;  %s1458_s14 = smov (!%p1266_p11), 120   ;;  %s1459_s18 = smov (!%p1266_p11), 112  }
  0x36   : > { %v1574_v4 = vld [vmem:[%s338_s6] sm:$0xf]  ;;  %380 = sbr.rel (%p1266_p11) target bundleno = 970 (0x3ca), region = 40  ;;  %s1460_s19 = smov (!%p1266_p11), 104  }
  0x3b   : > { %vm381_vm2 = vcmask 64512   ;;  %v462_v9 = vunpack.c.l.b16 %v1572_v3  ;;  %v1457_v11 = vmov 0   ;;  %v457_v12 = vunpack.c.l.b16 %v1565_v2  ;;  %v1589_v14 = vld [vmem:[#allocation2] sm:$0xff]  ;;  %v1625_v47 = vld [vmem:[#allocation2 + $0x18] sm:$0xff]  ;;  %v486_v51 = vld [vmem:[#allocation2 + $0x8] sm:$0xff] }
  0x3c   : > { %v386_v5 = vsel %vm381_vm2, %v1572_v3, 0  ;;  %1341 = vset.pattern.permute.xlu1 %v1457_v11  ;;  %1342 = vset.pattern.permute.xlu2 %v1457_v11  ;;  %vm423_vm3 = vcmask 7168   ;;  %vm436_vm4 = vcmask 1043456   ;;  %v520_v43 = vunpack.c.l.b16 %v1574_v4  ;;  %v570_v54 = vld [vmem:[#allocation2 + $0x10] sm:$0xff] }
  0x3d   : > { %395 = vmatpush.bf16.xpose.msra.mxu0 %v386_v5  ;;  %v463_v10 = vpack.c.b16 %v462_v9, %v462_v9  ;;  %1343 = vset.pattern.permute.xlu0 %v1457_v11  ;;  %v458_v13 = vpack.c.b16 %v457_v12, %v457_v12  ;;  %v438_v21 = vsel %vm436_vm4, %v1574_v4, 0 }
  0x3e   : > { %447 = vmatpush.bf16.msra.mxu1 %v438_v21  ;;  %v521_v45 = vpack.c.b16 %v520_v43, %v520_v43  ;;  %v668_v43 = vld [vmem:[#allocation3 + $0x18] sm:$0xff] }
  0x3f   : > { %548 = vrot.lane.b32.xlu2 %v463_v10, %s1459_s18 }
  0x44   : > { %1267 = vmatmul.msk.bf16.vlgmr.msra.gmra.mxu0 %vm381_vm2, %v1565_v2 }
  0x47   : > { %629 = vrot.lane.b32.xlu2 %v463_v10, %s1460_s19 }
  0x4f   : > { %627 = vrot.lane.b32.xlu2 %v458_v13, %s1460_s19 }
  0x99   : > { %v549_v20 = vpop.permute.xlu2 %548 }
  0x9a   : > { %v554_v23 = vsel %vm381_vm2, %v549_v20, 0 }
  0x9b   : > { %563 = vmatpush.bf16.xpose.msrb.mxu1 %v554_v23 }
  0xa1   : > { %v630_v22 = vpop.permute.xlu2 %629 }
  0xa2   : > { %v635_v24 = vsel %vm381_vm2, %v630_v22, 0 }
  0xa3   : > { %644 = vmatpush.bf16.xpose.msrb.mxu0 %v635_v24 }
  0xa9   : > { %v628_v25 = vpop.permute.xlu2 %627 }
  0xaa   : > { %1273 = vmatmul.msk.bf16.vlgmr.msrb.gmra.mxu0 %vm381_vm2, %v628_v25 }
  0xc1   : > { %v397_v6 = vpop.f32.mrf.mxu0 }
  0xc2   : > { %v402_v7 = vsel %vm381_vm2, %v397_v6, -inf }
  0xc3   : > { %403 = vmax.xlane.f32.xlu0 %v402_v7 }
  0xc9   : > { %v399_v8 = vpop.f32.mrf.mxu0 }
  0xd7   : > { %464 = vrot.lane.b32.xlu0 %v463_v10, %s1458_s14 }
 0x127   : > { %v1610_v33 = vpop.f32.mrf.mxu0 }
 0x128   : > { %v652_v34 = vsel %vm381_vm2, %v1610_v33, -inf }
 0x129   : > { %653 = vmax.xlane.f32.xlu0 %v652_v34 }
 0x12f   : > { %v648_v35 = vpop.f32.mrf.mxu0 }
 0x136   : > { %v404_v15 = vpop.xlane.xlu0 %403 }
 0x137   : > { %v1592_v16 = vmax.f32 %v1589_v14, %v404_v15 }
 0x139   : > { %v406_v17 = vsub.f32 %v1589_v14, %v1592_v16  ;;  %455 = vst.msk [vmem:[#allocation2] sm:$0xff] %vm423_vm3, %v1592_v16  ;;  %411 = vperm.xlu1 %1341, %v1592_v16  }
 0x13b   : > { %v407_v56 = vmul.f32 1.442695, %v406_v17 }
 0x141   : > { %459 = vrot.lane.b32.xlu1 %v458_v13, %s1458_s14 }
 0x149   : > { %546 = vrot.lane.b32.xlu1 %v458_v13, %s1459_s18  ;;  %v465_v18 = vpop.permute.xlu0 %464 }
 0x14a   : > { %v470_v19 = vsel %vm381_vm2, %v465_v18, 0 }
 0x14b   : > { %479 = vmatpush.bf16.xpose.msra.mxu2 %v470_v19 }
 0x19c   : > { %v654_v48 = vpop.xlane.xlu0 %653 }
 0x19d   : > { %v1628_v49 = vmax.f32 %v1625_v47, %v654_v48 }
 0x19f   : > { %v656_v50 = vsub.f32 %v1625_v47, %v1628_v49  ;;  %707 = vst.msk [vmem:[#allocation2 + $0x18] sm:$0xff] %vm423_vm3, %v1628_v49 }
 0x1ab   : > { %v412_v26 = vpop.permute.xlu1 %411 }
 0x1ac   : > { %v414_v27 = vsub.f32 %v397_v6, %v412_v26  ;;  %v417_v6 = vld [vmem:[#allocation3] sm:$0xff] }
 0x1ad   : > { %v425_v26 = vld [vmem:[#allocation4] sm:$0xff] }
 0x1ae   : > { %v415_v28 = vmul.f32 1.442695, %v414_v27 }
 0x1b0   : > { %1344 = vpow2.f32 %v415_v28 }
 0x1b1   : > { %1346 = vpow2.f32 %v407_v56 }
 0x1b3   : > { %v460_v29 = vpop.permute.xlu1 %459 }
 0x1b4   : > { %1269 = vmatmul.msk.bf16.vlgmr.msra.gmra.mxu2 %vm381_vm2, %v460_v29 }
 0x1b6   : > { %v1345_v30 = vpop.eup %1344 }
 0x1b7   : > { %v432_v31 = vpack.c.bf16 %v1345_v30, %v1345_v30  ;;  %v419_v46 = vsel %vm381_vm2, %v1345_v30, 0.0  ;;  %v1347_v62 = vpop.eup %1346  ;;  %v657_v30 = vmul.f32 1.442695, %v656_v50 }
 0x1b8   : > { %v418_v8 = vmul.f32 %v1347_v62, %v417_v6 }
 0x1b9   : > { %1268 = vmatmul.msk.bf16.vlgmr.msra.gmra.mxu1 %vm381_vm2, %v432_v31 }
 0x1bb   : > { %v547_v32 = vpop.permute.xlu1 %546 }
 0x1c9   : > { %1271 = vmatmul.msk.bf16.vlgmr.msrb.gmra.mxu1 %vm381_vm2, %v547_v32 }
 0x236   : > { %v1614_v36 = vpop.f32.mrf.mxu1 }
 0x237   : > { %v481_v37 = vpop.f32.mrf.mxu2 }
 0x238   : > { %v487_v38 = vsel %vm381_vm2, %v481_v37, -inf }
 0x239   : > { %488 = vmax.xlane.f32.xlu1 %v487_v38 }
 0x23e   : > { %v451_v39 = vpop.f32.mrf.mxu1 }
 0x23f   : > { %v483_v40 = vpop.f32.mrf.mxu2 }
 0x246   : > { %v1617_v41 = vpop.f32.mrf.mxu1 }
 0x247   : > { %v571_v42 = vsel %vm381_vm2, %v1617_v41, -inf }
 0x248   : > { %572 = vmax.xlane.f32.xlu2 %v571_v42 }
 0x24e   : > { %v567_v44 = vpop.f32.mrf.mxu1 }
 0x252   : > { %522 = vrot.lane.b32.xlu1 %v521_v45, %s1458_s14 }
 0x25a   : > { %603 = vrot.lane.b32.xlu1 %v521_v45, %s1459_s18 }
 0x284   : > { %420 = vadd.xlane.f32.xlu1 %v419_v46  ;;  %v511_v46 = vld [vmem:[#allocation4 + $0x8] sm:$0xff] }
 0x2ac   : > { %v489_v52 = vpop.xlane.xlu1 %488 }
 0x2ad   : > { %v490_v53 = vmax.f32 %v486_v51, %v489_v52 }
 0x2af   : > { %545 = vst.msk [vmem:[#allocation2 + $0x8] sm:$0xff] %vm423_vm3, %v490_v53  ;;  %496 = vperm.xlu2 %1342, %v490_v53   ;;  %v491_v59 = vsub.f32 %v486_v51, %v490_v53  ;;  %v676_v53 = vld [vmem:[#allocation4 + $0x18] sm:$0xff] }
 0x2b1   : > { %v492_v61 = vmul.f32 1.442695, %v491_v59 }
 0x2b7   : > { %661 = vperm.xlu2 %1342, %v1628_v49  }
 0x2bb   : > { %v573_v55 = vpop.xlane.xlu2 %572 }
 0x2bc   : > { %v574_v57 = vmax.f32 %v570_v54, %v573_v55 }
 0x2be   : > { %v575_v58 = vsub.f32 %v570_v54, %v574_v57  ;;  %626 = vst.msk [vmem:[#allocation2 + $0x10] sm:$0xff] %vm423_vm3, %v574_v57  ;;  %580 = vperm.xlu0 %1343, %v574_v57  }
 0x2bf   : > { %684 = vrot.lane.b32.xlu2 %v521_v45, %s1460_s19 }
 0x2c0   : > { %v576_v60 = vmul.f32 1.442695, %v575_v58  ;;  %v587_v58 = vld [vmem:[#allocation3 + $0x10] sm:$0xff] }
 0x2c2   : > { %1348 = vpow2.f32 %v576_v60 }
 0x2c3   : > { %1350 = vpow2.f32 %v492_v61 }
 0x2c4   : > { %v523_v1 = vpop.permute.xlu1 %522 }
 0x2c5   : > { %v528_v7 = vsel %vm436_vm4, %v523_v1, 0 }
 0x2c6   : > { %537 = vmatpush.bf16.msra.mxu3 %v528_v7 }
 0x2c7   : > { %428 = vperm.xlu2 %1342, %v1347_v62   ;;  %v595_v62 = vld [vmem:[#allocation4 + $0x10] sm:$0xff] }
 0x2c8   : > { %v1638_v63 = vpop.eup %1348 }
 0x2c9   : > { %598 = vperm.xlu1 %1341, %v1638_v63   ;;  %v1351_v0 = vpop.eup %1350  ;;  %v588_v59 = vmul.f32 %v1638_v63, %v587_v58 }
 0x2cc   : > { %v604_v5 = vpop.permute.xlu1 %603 }
 0x2cd   : > { %v609_v13 = vsel %vm436_vm4, %v604_v5, 0 }
 0x2ce   : > { %618 = vmatpush.bf16.msrb.mxu3 %v609_v13 }
 0x2cf   : > { %514 = vperm.xlu2 %1342, %v1351_v0  }
 0x2f7   : > { %v421_v9 = vpop.xlane.xlu1 %420 }
 0x2f8   : > { %v422_v10 = vadd.f32 %v421_v9, %v418_v8 }
 0x2fa   : > { %424 = vst.msk [vmem:[#allocation3] sm:$0xff] %vm423_vm3, %v422_v10 }
 0x309   : > { %v497_v11 = vpop.permute.xlu2 %496 }
 0x30a   : > { %v499_v12 = vsub.f32 %v481_v37, %v497_v11 }
 0x30c   : > { %v500_v14 = vmul.f32 1.442695, %v499_v12 }
 0x30e   : > { %1352 = vpow2.f32 %v500_v14 }
 0x311   : > { %v662_v15 = vpop.permute.xlu2 %661 }
 0x312   : > { %v664_v16 = vsub.f32 %v1610_v33, %v662_v15 }
 0x314   : > { %v1353_v17 = vpop.eup %1352  ;;  %v665_v18 = vmul.f32 1.442695, %v664_v16 }
 0x315   : > { %v505_v19 = vsel %vm381_vm2, %v1353_v17, 0.0  ;;  %v518_v20 = vpack.c.bf16 %v1353_v17, %v1353_v17 }
 0x316   : > { %1354 = vpow2.f32 %v665_v18  ;;  %506 = vadd.xlane.f32.xlu0 %v505_v19 }
 0x317   : > { %1270 = vmatmul.msk.bf16.vlgmr.msra.gmra.mxu3 %vm381_vm2, %v518_v20  ;;  %1356 = vpow2.f32 %v657_v30 }
 0x319   : > { %v685_v21 = vpop.permute.xlu2 %684 }
 0x31a   : > { %v690_v22 = vsel %vm436_vm4, %v685_v21, 0 }
 0x31b   : > { %699 = vmatpush.bf16.msrb.mxu2 %v690_v22 }
 0x31c   : > { %v1355_v23 = vpop.eup %1354 }
 0x31d   : > { %v670_v24 = vsel %vm381_vm2, %v1355_v23, 0.0  ;;  %v683_v25 = vpack.c.bf16 %v1355_v23, %v1355_v23  ;;  %v1357_v32 = vpop.eup %1356 }
 0x31e   : > { %671 = vadd.xlane.f32.xlu0 %v670_v24  ;;  %v669_v44 = vmul.f32 %v1357_v32, %v668_v43 }
 0x31f   : > { %1274 = vmatmul.msk.bf16.vlgmr.msrb.gmra.mxu2 %vm381_vm2, %v683_v25 }
 0x321   : > { %v429_v27 = vpop.permute.xlu2 %428 }
 0x322   : > { %v431_v28 = vmul.f32 %v429_v27, %v425_v26 }
 0x324   : > { %v453_v29 = vadd.f32 %v1614_v36, %v431_v28  ;;  %v503_v36 = vld [vmem:[#allocation3 + $0x8] sm:$0xff] }
 0x325   : > { %v504_v39 = vmul.f32 %v1351_v0, %v503_v36 }
 0x326   : > { %454 = vst.msk [vmem:[#allocation4] sm:$0xff] %vm381_vm2, %v453_v29 }
 0x329   : > { %v515_v47 = vpop.permute.xlu2 %514 }
 0x32a   : > { %v517_v48 = vmul.f32 %v515_v47, %v511_v46 }
 0x330   : > { %v581_v31 = vpop.permute.xlu0 %580 }
 0x331   : > { %v583_v33 = vsub.f32 %v1617_v41, %v581_v31 }
 0x332   : > { %679 = vperm.xlu0 %1343, %v1357_v32  }
 0x333   : > { %v584_v34 = vmul.f32 1.442695, %v583_v33 }
 0x335   : > { %1358 = vpow2.f32 %v584_v34 }
 0x33b   : > { %v1359_v35 = vpop.eup %1358  ;;  %v599_v0 = vpop.permute.xlu1 %598 }
 0x33c   : > { %v589_v37 = vsel %vm381_vm2, %v1359_v35, 0.0  ;;  %v602_v38 = vpack.c.bf16 %v1359_v35, %v1359_v35  ;;  %v601_v1 = vmul.f32 %v599_v0, %v595_v62 }
 0x33d   : > { %590 = vadd.xlane.f32.xlu2 %v589_v37 }
 0x33e   : > { %1272 = vmatmul.msk.bf16.vlgmr.msrb.gmra.mxu3 %vm381_vm2, %v602_v38 }
 0x389   : > { %v507_v40 = vpop.xlane.xlu0 %506 }
 0x38a   : > { %v508_v42 = vadd.f32 %v507_v40, %v504_v39 }
 0x38c   : > { %509 = vst.msk [vmem:[#allocation3 + $0x8] sm:$0xff] %vm423_vm3, %v508_v42 }
 0x391   : > { %v672_v45 = vpop.xlane.xlu0 %671 }
 0x392   : > { %v673_v41 = vadd.f32 %v672_v45, %v669_v44 }
 0x394   : > { %674 = vst.msk [vmem:[#allocation3 + $0x18] sm:$0xff] %vm423_vm3, %v673_v41 }
 0x39a   : > { %v539_v49 = vpop.f32.mrf.mxu3 }
 0x39b   : > { %v543_v50 = vadd.f32 %v539_v49, %v517_v48 }
 0x39d   : > { %544 = vst.msk [vmem:[#allocation4 + $0x8] sm:$0xff] %vm381_vm2, %v543_v50 }
 0x3a2   : > { %v541_v51 = vpop.f32.mrf.mxu3  ;;  %v701_v52 = vpop.f32.mrf.mxu2 }
 0x3a4   : > { %v680_v54 = vpop.permute.xlu0 %679 }
 0x3a5   : > { %v682_v55 = vmul.f32 %v680_v54, %v676_v53 }
 0x3a7   : > { %v705_v56 = vadd.f32 %v701_v52, %v682_v55 }
 0x3a9   : > { %706 = vst.msk [vmem:[#allocation4 + $0x18] sm:$0xff] %vm381_vm2, %v705_v56 }
 0x3aa   : > { %v703_v57 = vpop.f32.mrf.mxu2 }
 0x3b0   : > { %v591_v60 = vpop.xlane.xlu2 %590 }
 0x3b1   : > { %v592_v61 = vadd.f32 %v591_v60, %v588_v59 }
 0x3b3   : > { %593 = vst.msk [vmem:[#allocation3 + $0x10] sm:$0xff] %vm423_vm3, %v592_v61 }
 0x3c1   : > { %v620_v5 = vpop.f32.mrf.mxu3 }
 0x3c2   : > { %v624_v6 = vadd.f32 %v620_v5, %v601_v1 }
 0x3c4   : > { %625 = vst.msk [vmem:[#allocation4 + $0x10] sm:$0xff] %vm381_vm2, %v624_v6 }
 0x3c9   : > { %v622_v7 = vpop.f32.mrf.mxu3 }
 0x3ca PF: > { %p1275_p12 = scmp.ne.s32.totalorder %s1536_s11, %s1534_s10 }
 0x3cb   : > { %s1462_s10 = smov (!%p1275_p12), 120   ;;  %s1463_s11 = smov (!%p1275_p12), 112  }
 0x3cc   : > { %711 = sbr.rel (%p1275_p12) target bundleno = 2095 (0x82f), region = 44  ;;  %s1464_s20 = smov (!%p1275_p12), 104  }
 0x3cd   : > { %s1465_s21 = smov (!%p1275_p12), 8   ;;  %s1466_s22 = smov (!%p1275_p12), 24  }
 0x3ce   : > { %s1467_s23 = smov (!%p1275_p12), 16  }
 0x3d1   : > { %vm717_vm5 = vcmask 64512   ;;  %v712_v8 = vlaneseq  ;;  %v808_v15 = vunpack.c.l.b16 %v1572_v3  ;;  %v1461_v17 = vmov 0   ;;  %v1729_v54 = vld [vmem:[#allocation2 + $0x18] sm:$0xff]  ;;  %v927_v61 = vld [vmem:[#allocation2 + $0x10] sm:$0xff] }
 0x3d2   : > { %v722_v63 = vsel %vm717_vm5, %v1572_v3, 0  ;;  %1360 = vset.pattern.permute.xlu1 %v1461_v17  ;;  %1361 = vset.pattern.permute.xlu2 %v1461_v17  ;;  %v803_v18 = vunpack.c.l.b16 %v1565_v2  ;;  %v1687_v3 = vld [vmem:[#allocation2] sm:$0xff]  ;;  %vm760_vm7 = vcmask 7168   ;;  %vm773_vm8 = vcmask 1043456  }
 0x3d3   : > { %731 = vmatpush.bf16.xpose.msra.mxu0 %v722_v63  ;;  %v1671_v9 = vshrl.u32 %v712_v8, 7  ;;  %v1673_v10 = vand.u32 127, %v712_v8  ;;  %v809_v16 = vpack.c.b16 %v808_v15, %v808_v15  ;;  %1362 = vset.pattern.permute.xlu0 %v1461_v17  ;;  %v775_v25 = vsel %vm773_vm8, %v1574_v4, 0  ;;  %v754_v8 = vld [vmem:[#allocation3] sm:$0xff] }
 0x3d4   : > { %v804_v19 = vpack.c.b16 %v803_v18, %v803_v18  ;;  %784 = vmatpush.bf16.msra.mxu1 %v775_v25  ;;  %v867_v50 = vunpack.c.l.b16 %v1574_v4  ;;  %v833_v4 = vld [vmem:[#allocation2 + $0x8] sm:$0xff]  ;;  %vm1097_vm9 = vcmask 130048   ;;  %vm1099_vm10 = vcmask 195584  }
 0x3d5   : > { %vm716_vm6 = vcmp.ge.s32.totalorder %v1671_v9, %v1673_v10  ;;  %904 = vrot.lane.b32.xlu2 %v809_v16, %s1463_s11  ;;  %vm1102_vm11 = vcmask 257024  }
 0x3d6   : > { %v868_v52 = vpack.c.b16 %v867_v50, %v867_v50 }
 0x3da   : > { %1276 = vmatmul.msk.bf16.vlgmr.msra.gmra.mxu0 %vm717_vm5, %v1565_v2 }
 0x3dd   : > { %995 = vrot.lane.b32.xlu2 %v809_v16, %s1464_s20 }
 0x3e5   : > { %993 = vrot.lane.b32.xlu2 %v804_v19, %s1464_s20 }
 0x42f   : > { %v905_v24 = vpop.permute.xlu2 %904 }
 0x430   : > { %v910_v26 = vsel %vm717_vm5, %v905_v24, 0 }
 0x431   : > { %919 = vmatpush.bf16.xpose.msrb.mxu1 %v910_v26 }
 0x437   : > { %v996_v27 = vpop.permute.xlu2 %995 }
 0x438   : > { %v1001_v28 = vsel %vm717_vm5, %v996_v27, 0 }
 0x439   : > { %1010 = vmatpush.bf16.xpose.msrb.mxu0 %v1001_v28 }
 0x43f   : > { %v994_v29 = vpop.permute.xlu2 %993 }
 0x440   : > { %1282 = vmatmul.msk.bf16.vlgmr.msrb.gmra.mxu0 %vm717_vm5, %v994_v29 }
 0x457   : > { %v733_v11 = vpop.f32.mrf.mxu0 }
 0x458   : > { %v737_v12 = vsel %vm716_vm6, %v733_v11, -1e+30 }
 0x459   : > { %v739_v13 = vsel %vm717_vm5, %v737_v12, -inf }
 0x45a   : > { %740 = vmax.xlane.f32.xlu0 %v739_v13 }
 0x45f   : > { %v735_v14 = vpop.f32.mrf.mxu0 }
 0x46e   : > { %810 = vrot.lane.b32.xlu0 %v809_v16, %s1462_s10 }
 0x4bd   : > { %v1012_v38 = vpop.f32.mrf.mxu0 }
 0x4be   : > { %v1016_v36 = vsel %vm716_vm6, %v1012_v38, -1e+30 }
 0x4bf   : > { %v1019_v39 = vsel %vm717_vm5, %v1016_v36, -inf }
 0x4c0   : > { %1020 = vmax.xlane.f32.xlu0 %v1019_v39  ;;  %v850_v39 = vld [vmem:[#allocation3 + $0x8] sm:$0xff] }
 0x4c5   : > { %v1014_v40 = vpop.f32.mrf.mxu0 }
 0x4cd   : > { %v741_v20 = vpop.xlane.xlu0 %740 }
 0x4ce   : > { %v1690_v21 = vmax.f32 %v1687_v3, %v741_v20 }
 0x4d0   : > { %v743_v22 = vsub.f32 %v1687_v3, %v1690_v21  ;;  %792 = vst.msk [vmem:[#allocation2] sm:$0xff] %vm760_vm7, %v1690_v21  ;;  %748 = vperm.xlu1 %1360, %v1690_v21  }
 0x4d2   : > { %v744_v6 = vmul.f32 1.442695, %v743_v22 }
 0x4d8   : > { %805 = vrot.lane.b32.xlu1 %v804_v19, %s1462_s10 }
 0x4e0   : > { %902 = vrot.lane.b32.xlu1 %v804_v19, %s1463_s11  ;;  %v811_v2 = vpop.permute.xlu0 %810 }
 0x4e1   : > { %v816_v23 = vsel %vm717_vm5, %v811_v2, 0 }
 0x4e2   : > { %825 = vmatpush.bf16.xpose.msra.mxu2 %v816_v23 }
 0x533   : > { %v1021_v55 = vpop.xlane.xlu0 %1020 }
 0x534   : > { %v1732_v56 = vmax.f32 %v1729_v54, %v1021_v55 }
 0x536   : > { %v1023_v57 = vsub.f32 %v1729_v54, %v1732_v56  ;;  %1074 = vst.msk [vmem:[#allocation2 + $0x18] sm:$0xff] %vm760_vm7, %v1732_v56 }
 0x542   : > { %v749_v30 = vpop.permute.xlu1 %748 }
 0x543   : > { %v751_v31 = vsub.f32 %v737_v12, %v749_v30 }
 0x545   : > { %v752_v32 = vmul.f32 1.442695, %v751_v31 }
 0x547   : > { %1363 = vpow2.f32 %v752_v32 }
 0x548   : > { %1365 = vpow2.f32 %v744_v6 }
 0x54a   : > { %v806_v33 = vpop.permute.xlu1 %805 }
 0x54b   : > { %1278 = vmatmul.msk.bf16.vlgmr.msra.gmra.mxu2 %vm717_vm5, %v806_v33 }
 0x54d   : > { %v1364_v34 = vpop.eup %1363 }
 0x54e   : > { %v769_v35 = vpack.c.bf16 %v1364_v34, %v1364_v34  ;;  %v756_v53 = vsel %vm717_vm5, %v1364_v34, 0.0  ;;  %v1366_v63 = vpop.eup %1365 }
 0x54f   : > { %v755_v10 = vmul.f32 %v1366_v63, %v754_v8 }
 0x550   : > { %1277 = vmatmul.msk.bf16.vlgmr.msra.gmra.mxu1 %vm717_vm5, %v769_v35 }
 0x552   : > { %v903_v37 = vpop.permute.xlu1 %902 }
 0x560   : > { %1280 = vmatmul.msk.bf16.vlgmr.msrb.gmra.mxu1 %vm717_vm5, %v903_v37 }
 0x5cd   : > { %v1712_v42 = vpop.f32.mrf.mxu1 }
 0x5ce   : > { %v827_v43 = vpop.f32.mrf.mxu2 }
 0x5cf   : > { %v831_v44 = vsel %vm716_vm6, %v827_v43, -1e+30 }
 0x5d0   : > { %v834_v45 = vsel %vm717_vm5, %v831_v44, -inf }
 0x5d1   : > { %835 = vmax.xlane.f32.xlu1 %v834_v45 }
 0x5d5   : > { %v788_v41 = vpop.f32.mrf.mxu1 }
 0x5d6   : > { %v829_v46 = vpop.f32.mrf.mxu2  ;;  %v1035_v41 = vld [vmem:[#allocation3 + $0x18] sm:$0xff] }
 0x5d7   : > { %v762_v46 = vld [vmem:[#allocation4] sm:$0xff] }
 0x5dd   : > { %v921_v47 = vpop.f32.mrf.mxu1 }
 0x5de   : > { %v1721_v48 = vsel %vm716_vm6, %v921_v47, -1e+30 }
 0x5df   : > { %v928_v49 = vsel %vm717_vm5, %v1721_v48, -inf }
 0x5e0   : > { %929 = vmax.xlane.f32.xlu2 %v928_v49 }
 0x5e5   : > { %v923_v51 = vpop.f32.mrf.mxu1 }
 0x5ea   : > { %869 = vrot.lane.b32.xlu1 %v868_v52, %s1462_s10 }
 0x5f2   : > { %960 = vrot.lane.b32.xlu1 %v868_v52, %s1463_s11 }
 0x61c   : > { %757 = vadd.xlane.f32.xlu1 %v756_v53 }
 0x644   : > { %v836_v58 = vpop.xlane.xlu1 %835 }
 0x645   : > { %v837_v59 = vmax.f32 %v833_v4, %v836_v58 }
 0x647   : > { %v838_v60 = vsub.f32 %v833_v4, %v837_v59  ;;  %892 = vst.msk [vmem:[#allocation2 + $0x8] sm:$0xff] %vm760_vm7, %v837_v59  ;;  %843 = vperm.xlu2 %1361, %v837_v59   ;;  %v858_v59 = vld [vmem:[#allocation4 + $0x8] sm:$0xff] }
 0x649   : > { %v839_v26 = vmul.f32 1.442695, %v838_v60 }
 0x64f   : > { %1028 = vperm.xlu2 %1361, %v1732_v56  }
 0x653   : > { %v930_v62 = vpop.xlane.xlu2 %929 }
 0x654   : > { %v931_v0 = vmax.f32 %v927_v61, %v930_v62 }
 0x656   : > { %v932_v1 = vsub.f32 %v927_v61, %v931_v0  ;;  %983 = vst.msk [vmem:[#allocation2 + $0x10] sm:$0xff] %vm760_vm7, %v931_v0  ;;  %937 = vperm.xlu0 %1362, %v931_v0  }
 0x657   : > { %1051 = vrot.lane.b32.xlu2 %v868_v52, %s1464_s20 }
 0x658   : > { %v933_v35 = vmul.f32 1.442695, %v932_v1  ;;  %v944_v1 = vld [vmem:[#allocation3 + $0x10] sm:$0xff] }
 0x65c   : > { %v870_v5 = vpop.permute.xlu1 %869 }
 0x65d   : > { %v875_v9 = vsel %vm773_vm8, %v870_v5, 0 }
 0x65e   : > { %884 = vmatpush.bf16.msra.mxu3 %v875_v9 }
 0x664   : > { %v961_v7 = vpop.permute.xlu1 %960 }
 0x665   : > { %v966_v21 = vsel %vm773_vm8, %v961_v7, 0 }
 0x666   : > { %975 = vmatpush.bf16.msrb.mxu3 %v966_v21 }
 0x68f   : > { %v758_v11 = vpop.xlane.xlu1 %757 }
 0x690   : > { %v759_v12 = vadd.f32 %v758_v11, %v755_v10  ;;  %v952_v11 = vld [vmem:[#allocation4 + $0x10] sm:$0xff] }
 0x692   : > { %761 = vst.msk [vmem:[#allocation3] sm:$0xff] %vm760_vm7, %v759_v12 }
 0x699   : > { %v793_v34 = vld [vmem:[#allocation3] sm:$0xff] }
 0x6a1   : > { %v844_v13 = vpop.permute.xlu2 %843 }
 0x6a2   : > { %v846_v14 = vsub.f32 %v831_v44, %v844_v13 }
 0x6a4   : > { %v847_v15 = vmul.f32 1.442695, %v846_v14 }
 0x6a6   : > { %1367 = vpow2.f32 %v847_v15 }
 0x6a9   : > { %v1029_v16 = vpop.permute.xlu2 %1028 }
 0x6aa   : > { %v1031_v17 = vsub.f32 %v1016_v36, %v1029_v16  ;;  %v1024_v36 = vmul.f32 1.442695, %v1023_v57 }
 0x6ac   : > { %v1368_v18 = vpop.eup %1367  ;;  %v1032_v19 = vmul.f32 1.442695, %v1031_v17 }
 0x6ad   : > { %v852_v3 = vsel %vm717_vm5, %v1368_v18, 0.0  ;;  %v865_v20 = vpack.c.bf16 %v1368_v18, %v1368_v18  ;;  %v1043_v18 = vld [vmem:[#allocation4 + $0x18] sm:$0xff] }
 0x6ae   : > { %1369 = vpow2.f32 %v1032_v19  ;;  %853 = vadd.xlane.f32.xlu2 %v852_v3 }
 0x6af   : > { %1279 = vmatmul.msk.bf16.vlgmr.msra.gmra.mxu3 %vm717_vm5, %v865_v20  ;;  %1371 = vpow2.f32 %v839_v26 }
 0x6b1   : > { %v1052_v22 = vpop.permute.xlu2 %1051 }
 0x6b2   : > { %v1057_v2 = vsel %vm773_vm8, %v1052_v22, 0 }
 0x6b3   : > { %1066 = vmatpush.bf16.msrb.mxu2 %v1057_v2 }
 0x6b4   : > { %v1370_v23 = vpop.eup %1369 }
 0x6b5   : > { %v1037_v24 = vsel %vm717_vm5, %v1370_v23, 0.0  ;;  %v1050_v25 = vpack.c.bf16 %v1370_v23, %v1370_v23  ;;  %v1372_v30 = vpop.eup %1371 }
 0x6b6   : > { %1038 = vadd.xlane.f32.xlu1 %v1037_v24  ;;  %v851_v40 = vmul.f32 %v1372_v30, %v850_v39 }
 0x6b7   : > { %1283 = vmatmul.msk.bf16.vlgmr.msrb.gmra.mxu2 %vm717_vm5, %v1050_v25 }
 0x6c6   : > { %765 = vperm.xlu2 %1361, %v1366_v63  }
 0x6c8   : > { %v938_v27 = vpop.permute.xlu0 %937 }
 0x6c9   : > { %v940_v28 = vsub.f32 %v1721_v48, %v938_v27 }
 0x6cb   : > { %v941_v29 = vmul.f32 1.442695, %v940_v28 }
 0x6cd   : > { %1373 = vpow2.f32 %v941_v29 }
 0x6ce   : > { %1375 = vrcp.f32 %v793_v34 }
 0x6cf   : > { %861 = vperm.xlu1 %1360, %v1372_v30   ;;  %1377 = vpow2.f32 %v933_v35 }
 0x6d0   : > { %1379 = vpow2.f32 %v1024_v36 }
 0x6d3   : > { %v1374_v31 = vpop.eup %1373 }
 0x6d4   : > { %v946_v32 = vsel %vm717_vm5, %v1374_v31, 0.0  ;;  %v959_v33 = vpack.c.bf16 %v1374_v31, %v1374_v31  ;;  %v1376_v37 = vpop.eup %1375 }
 0x6d5   : > { %947 = vadd.xlane.f32.xlu0 %v946_v32  ;;  %v1378_v38 = vpop.eup %1377 }
 0x6d6   : > { %1281 = vmatmul.msk.bf16.vlgmr.msrb.gmra.mxu3 %vm717_vm5, %v959_v33  ;;  %v1380_v45 = vpop.eup %1379 }
 0x6d7   : > { %v1036_v47 = vmul.f32 %v1380_v45, %v1035_v41 }
 0x6e9   : > { %798 = vperm.xlu0 %1362, %v1376_v37  }
 0x6f1   : > { %955 = vperm.xlu0 %1362, %v1378_v38  }
 0x721   : > { %v854_v43 = vpop.xlane.xlu2 %853 }
 0x722   : > { %v855_v44 = vadd.f32 %v854_v43, %v851_v40 }
 0x724   : > { %856 = vst.msk [vmem:[#allocation3 + $0x8] sm:$0xff] %vm760_vm7, %v855_v44 }
 0x729   : > { %v1039_v48 = vpop.xlane.xlu1 %1038  ;;  %v766_v49 = vpop.permute.xlu2 %765 }
 0x72a   : > { %v1040_v50 = vadd.f32 %v1039_v48, %v1036_v47  ;;  %v768_v51 = vmul.f32 %v766_v49, %v762_v46 }
 0x72b   : > { %v893_v52 = vld [vmem:[#allocation3 + $0x8] sm:$0xff] }
 0x72c   : > { %1041 = vst.msk [vmem:[#allocation3 + $0x18] sm:$0xff] %vm760_vm7, %v1040_v50  ;;  %v790_v53 = vadd.f32 %v1712_v42, %v768_v51  ;;  %1381 = vrcp.f32 %v893_v52  ;;  %v945_v42 = vmul.f32 %v1378_v38, %v944_v1 }
 0x72e   : > { %791 = vst.msk [vmem:[#allocation4] sm:$0xff] %vm717_vm5, %v790_v53 }
 0x732   : > { %v1382_v54 = vpop.eup %1381  ;;  %v886_v55 = vpop.f32.mrf.mxu3 }
 0x733   : > { %898 = vperm.xlu2 %1361, %v1382_v54   ;;  %v1075_v56 = vld [vmem:[#allocation3 + $0x18] sm:$0xff] }
 0x734   : > { %1383 = vrcp.f32 %v1075_v56 }
 0x735   : > { %v795_v26 = vld [vmem:[#allocation4] sm:$0xff] }
 0x73a   : > { %v1384_v57 = vpop.eup %1383  ;;  %v888_v4 = vpop.f32.mrf.mxu3 }
 0x73b   : > { %v1068_v58 = vpop.f32.mrf.mxu2  ;;  %1046 = vperm.xlu2 %1361, %v1380_v45   ;;  %1080 = vperm.xlu0 %1362, %v1384_v57  }
 0x741   : > { %v862_v60 = vpop.permute.xlu1 %861 }
 0x742   : > { %v864_v61 = vmul.f32 %v862_v60, %v858_v59 }
 0x743   : > { %v1070_v62 = vpop.f32.mrf.mxu2 }
 0x744   : > { %v890_v0 = vadd.f32 %v886_v55, %v864_v61 }
 0x746   : > { %891 = vst.msk [vmem:[#allocation4 + $0x8] sm:$0xff] %vm717_vm5, %v890_v0 }
 0x748   : > { %v948_v5 = vpop.xlane.xlu0 %947 }
 0x749   : > { %v949_v6 = vadd.f32 %v948_v5, %v945_v42 }
 0x74b   : > { %950 = vst.msk [vmem:[#allocation3 + $0x10] sm:$0xff] %vm760_vm7, %v949_v6 }
 0x74d   : > { %v895_v15 = vld [vmem:[#allocation4 + $0x8] sm:$0xff] }
 0x752   : > { %v984_v7 = vld [vmem:[#allocation3 + $0x10] sm:$0xff] }
 0x753   : > { %1385 = vrcp.f32 %v984_v7 }
 0x759   : > { %v1386_v63 = vpop.eup %1385  ;;  %v977_v8 = vpop.f32.mrf.mxu3 }
 0x75a   : > { %989 = vperm.xlu1 %1360, %v1386_v63  }
 0x75b   : > { %v799_v9 = vpop.permute.xlu0 %798 }
 0x75c   : > { %v801_v28 = vmul.f32 %v799_v9, %v795_v26 }
 0x761   : > { %v979_v10 = vpop.f32.mrf.mxu3 }
 0x763   : > { %v956_v12 = vpop.permute.xlu0 %955 }
 0x764   : > { %v958_v13 = vmul.f32 %v956_v12, %v952_v11 }
 0x766   : > { %v981_v14 = vadd.f32 %v977_v8, %v958_v13 }
 0x768   : > { %982 = vst.msk [vmem:[#allocation4 + $0x10] sm:$0xff] %vm717_vm5, %v981_v14 }
 0x76f   : > { %v986_v24 = vld [vmem:[#allocation4 + $0x10] sm:$0xff] }
 0x78d   : > { %v899_v16 = vpop.permute.xlu2 %898 }
 0x78e   : > { %v901_v17 = vmul.f32 %v899_v16, %v895_v15 }
 0x790   : > { %1085 = vrot.lane.b32.xlu1 %v901_v17, %s1465_s21 }
 0x795   : > { %v1047_v19 = vpop.permute.xlu2 %1046 }
 0x796   : > { %v1049_v3 = vmul.f32 %v1047_v19, %v1043_v18 }
 0x798   : > { %v1072_v20 = vadd.f32 %v1068_v58, %v1049_v3 }
 0x79a   : > { %1073 = vst.msk [vmem:[#allocation4 + $0x18] sm:$0xff] %vm717_vm5, %v1072_v20 }
 0x7a1   : > { %v1077_v21 = vld [vmem:[#allocation4 + $0x18] sm:$0xff] }
 0x7ad   : > { %v1081_v22 = vpop.permute.xlu0 %1080 }
 0x7ae   : > { %v1083_v2 = vmul.f32 %v1081_v22, %v1077_v21 }
 0x7b0   : > { %1093 = vrot.lane.b32.xlu0 %v1083_v2, %s1466_s22 }
 0x7cc   : > { %v990_v23 = vpop.permute.xlu1 %989 }
 0x7cd   : > { %v992_v25 = vmul.f32 %v990_v23, %v986_v24 }
 0x7cf   : > { %1089 = vrot.lane.b32.xlu2 %v992_v25, %s1467_s23 }
 0x802   : > { %v1086_v27 = vpop.permute.xlu1 %1085 }
 0x803   : > { %v1096_v29 = vsel %vm717_vm5, %v801_v28, %v1086_v27 }
 0x822   : > { %v1094_v31 = vpop.permute.xlu0 %1093 }
 0x829   : > { %v1090_v30 = vpop.permute.xlu2 %1089 }
 0x82a   : > { %v1098_v32 = vsel %vm1097_vm9, %v1096_v29, %v1090_v30 }
 0x82b   : > { %v1100_v33 = vsel %vm1099_vm10, %v1098_v32, %v1094_v31 }
 0x82c   : > { %v1101_v34 = vpack.c.bf16 %v1100_v33, %v1100_v33 }
 0x82e   : > { %1103 = vst.msk [vmem:[%s351_s16] sm:$0xf] %vm1102_vm11, %v1101_v34 }
 0x82f PF: > { %s28_s29 = sadd.s32 1, %s1451_s29   ;;  %s1794_s26 = smov %s1443_s28 }
 0x830   : > { %p25_p13 = scmp.ge.s32.totalorder %s28_s29, 8   ;;  %s1795_s27 = smov %s1447_s0 }
 0x831   : > { %s1796_s28 = smov %s1799_s1  ;;  %s1797_s0 = smov %s1803_s30 }
 0x832   :  { %27 = sbr.rel (!%p25_p13) target bundleno = 10 (0xa), region = 98 }

</bundles_post_ra>
